<compile_context>
chip_gen: v7x
topology: tpu7x:2x2x1
jax: 0.10.0
libtpu: 0.0.40
codegen_flags: <defaults>
</compile_context>

<pallas_src>
import functools

import jax
import jax.numpy as jnp
from jax import lax
from jax.experimental import pallas as pl
from jax.experimental.pallas import tpu as pltpu

_OUT_SIZES = (1, 2, 4, 6)                       # pyramid levels -> 1+4+16+36 = 57 cells
_NUM_CELLS = sum(o * o for o in _OUT_SIZES)     # 57


def _round_up(v, m):
    return ((v + m - 1) // m) * m


def _spp_windows(h, output_size):
    """Per-output-cell input windows along one spatial axis, reproducing the
    kernel_size/padding logic of spatial_pyramid_pooling (torch max_pool2d with
    stride=kernel).  Clipping the windows to [0, h) implements PyTorch's
    implicit -inf padding for max pooling."""
    if h < output_size:
        raise ValueError(f"spatial size {h} too small for pyramid level {output_size}")
    k = h // output_size
    pad = 0
    if h // k > output_size:
        k += 1
        pad = 1
    out = (h + 2 * pad - k) // k + 1
    if out != output_size:
        raise ValueError(f"unsupported spatial size {h} for pyramid level {output_size}")
    windows = tuple(
        (max(i * k - pad, 0), min(i * k - pad + k, h)) for i in range(output_size))
    regular = (pad == 0) and (k * output_size == h)      # windows exactly tile [0, h)
    return windows, regular


def _spp_kernel(x_ref, out_ref, *, c, level_specs, fused_wc, f_total, f_pad,
                compute_dtype, slab_output):
    # x_ref  : (Bt, H, W, C) NHWC (channels lane-dense)          if not fused_wc
    #          (Bt, H, W*C)  (W folded onto the lane axis)       if fused_wc
    # out_ref: (Bt, F_pad)   2-D lane-dense output (no size-1 sublane axis)
    bt = out_ref.shape[0]
    out_dtype = out_ref.dtype

    def row_window_max(rlo, rhi):
        # One H-window at a time, row-by-row straight from the ref: bounds the
        # live vreg set and only up-casts data that is actually reduced.
        acc = x_ref[:, rlo].astype(compute_dtype)
        for r in range(rlo + 1, rhi):
            acc = jnp.maximum(acc, x_ref[:, r].astype(compute_dtype))
        return acc                                    # (Bt, W, C) or (Bt, W*C)

    cells_out = []                                    # only used when slab_output
    off = 0
    for o, (windows, regular) in zip(_OUT_SIZES, level_specs):
        for i, (rlo, rhi) in enumerate(windows):
            rw = row_window_max(rlo, rhi)
            if fused_wc:
                # W and C share the lane axis: column windows are elementwise
                # maxima of lane slices (pure VPU, no XLU).
                row_cells = []
                for (clo, chi) in windows:
                    cell = rw[:, clo * c:(clo + 1) * c]
                    for wj in range(clo + 1, chi):
                        cell = jnp.maximum(cell, rw[:, wj * c:(wj + 1) * c])
                    row_cells.append(cell)
            elif regular:
                # pad == 0 and W % o == 0: one reshape-reduce per row-window
                # instead of o separate sublane-window reduces.
                k = rw.shape[1] // o
                grouped = jnp.max(rw.reshape(bt, o, k, c), axis=2)   # (Bt, o, C)
                row_cells = [grouped[:, j, :] for j in range(o)]
            else:
                row_cells = [jnp.max(rw[:, clo:chi, :], axis=1) for (clo, chi) in windows]

            if slab_output:
                cells_out.extend(row_cells)
            else:
                # Direct lane-aligned stores at static offsets (C=128 multiple
                # -> unmasked vst); no register concat of the 57-cell slab.
                for j, cell in enumerate(row_cells):
                    dst = off + (i * o + j) * c
                    out_ref[:, dst:dst + c] = cell.astype(out_dtype)
        off += o * o * c

    if slab_output:
        # Small-C path: the whole 57*C slab is at most a few vregs wide, so one
        # dense full-block store is cheaper than 57 sub-lane-group masked stores.
        if f_pad > f_total:
            cells_out.append(jnp.zeros((bt, f_pad - f_total), compute_dtype))
        out_ref[...] = jnp.concatenate(cells_out, axis=-1).astype(out_dtype)
    elif f_pad > f_total:
        out_ref[:, f_total:] = jnp.zeros((bt, f_pad - f_total), out_dtype)


def _choose_batch_tile(n, per_sample_bytes, budget_bytes, min_steps):
    """Largest batch tile that fits the per-buffer VMEM budget, prefers bt % 8 == 0
    (sublane-dense output stores) dividing n, and keeps >= min_steps grid steps
    when the batch allows (pipelining / both TensorCores on v7x)."""
    fit_cap = max(1, int(budget_bytes) // max(int(per_sample_bytes), 1))
    fit_cap = min(fit_cap, n)
    cap = fit_cap
    if n > 8:
        cap = min(cap, max(8, n // min_steps))
    m = (cap // 8) * 8
    while m >= 8:                         # largest multiple-of-8 divisor of n within cap
        if n % m == 0:
            return m
        m -= 8
    if n <= fit_cap:
        return n                          # single full-batch block (full-dim block is legal)
    if fit_cap >= 8:
        return (fit_cap // 8) * 8         # partial last block (Pallas masks the writeback)
    return n if n <= 8 else 8


def spp_module_forward(x, *, data_format="NCHW"):
    """Forward pass of SppModule: concat of 1x1 / 2x2 / 4x4 / 6x6 max-pool pyramids."""
    assert x.ndim == 4
    if data_format == "NCHW":
        n, c, h, w = x.shape
        # TODO(synk): in the full SppDenseNet, emit the backbone activation in NHWC
        # and call with data_format="NHWC" so this extra HBM round-trip disappears.
        x_nhwc = jnp.transpose(x, (0, 2, 3, 1))
    elif data_format == "NHWC":
        n, h, w, c = x.shape
        x_nhwc = x
    else:
        raise ValueError(f"unknown data_format {data_format!r}")
    assert h == w, "spatial_pyramid_pooling requires square spatial dims"

    level_specs = tuple(_spp_windows(h, o) for o in _OUT_SIZES)
    f_total = _NUM_CELLS * c
    f_pad = _round_up(f_total, 128)

    # Lane utilisation: C % 128 == 0 (the DenseNet case, C=128) keeps NHWC with
    # channels lane-dense; small C folds W*C onto the lane axis instead of
    # padding C up to 128 on every DMA byte and VPU lane.
    fused_wc = (c % 128 != 0) and (f_total <= 4096)

    in_dtype = x.dtype
    out_dtype = in_dtype

    kind = ""
    try:
        kind = jax.devices()[0].device_kind.lower()
    except Exception:
        pass
    try:
        vmem_capacity = int(pltpu.get_tpu_info().vmem_capacity_bytes)
    except Exception:
        vmem_capacity = 64 << 20          # conservative (v7x per-core size)

    # max is exact in bf16: keep bf16 math on chips with bf16 VALUs (v6e/v7x),
    # upcast to f32 on v5e and older.
    bf16_vpu = not any(t in kind for t in ("v2", "v3", "v4", "v5"))
    compute_dtype = jnp.bfloat16 if (in_dtype == jnp.bfloat16 and bf16_vpu) else jnp.float32

    in_itemsize = jnp.dtype(in_dtype).itemsize
    out_itemsize = jnp.dtype(out_dtype).itemsize
    if fused_wc:
        per_in = _round_up(h, 8) * _round_up(w * c, 128) * in_itemsize
    else:
        per_in = h * _round_up(w, 8) * _round_up(c, 128) * in_itemsize
    per_out = f_pad * out_itemsize

    # v7x has 2 TensorCores -> aim for >= 2 grid steps per core; single-TC chips
    # only need >= 2 steps total for DMA/compute overlap.
    min_steps = 4 if "v7" in kind else 2
    budget = (20 << 20) if vmem_capacity >= (96 << 20) else (8 << 20)
    bt = _choose_batch_tile(n, per_in + per_out, budget, min_steps)

    # Explicit VMEM limit sized against the padded, double-buffered footprint.
    in_block_bytes = bt * per_in
    out_block_bytes = _round_up(bt, 8) * f_pad * out_itemsize
    need = 2 * (in_block_bytes + out_block_bytes) + (4 << 20)
    vmem_limit = int(min(max(need, 16 << 20), max(vmem_capacity - (28 << 20), 32 << 20)))

    kernel = functools.partial(
        _spp_kernel, c=c, level_specs=level_specs, fused_wc=fused_wc,
        f_total=f_total, f_pad=f_pad, compute_dtype=compute_dtype,
        slab_output=fused_wc)

    if fused_wc:
        x_in = x_nhwc.reshape(n, h, w * c)
        in_spec = pl.BlockSpec((bt, h, w * c), lambda b: (b, 0, 0))
    else:
        x_in = x_nhwc
        in_spec = pl.BlockSpec((bt, h, w, c), lambda b: (b, 0, 0, 0))

    y = pl.pallas_call(
        kernel,
        out_shape=jax.ShapeDtypeStruct((n, f_pad), out_dtype),
        grid=(pl.cdiv(n, bt),),
        in_specs=[in_spec],
        out_specs=pl.BlockSpec((bt, f_pad), lambda b: (b, 0)),
        compiler_params=pltpu.CompilerParams(
            dimension_semantics=("parallel",),
            vmem_limit_bytes=vmem_limit),
    )(x_in)

    # Wrapper glue on the (tiny, 57*C per sample) pooled output: the kernel emits
    # each level cell-major / channel-minor; torch's .view() is channel-major.
    y = y[:, :f_total]
    segs = []
    base = 0
    for o in _OUT_SIZES:
        seg = y[:, base:base + o * o * c].reshape(n, o * o, c)
        segs.append(jnp.transpose(seg, (0, 2, 1)).reshape(n, c * o * o))
        base += o * o * c
    return jnp.concatenate(segs, axis=1)


def _ref_forward(x):
    """Pure-JAX reference mimicking torch.nn.functional.max_pool2d exactly (NCHW)."""
    n, c, h, w = x.shape
    neg_inf = jnp.array(-jnp.inf, dtype=x.dtype)
    outs = []
    for o in _OUT_SIZES:
        k = h // o
        pad = 0
        if h // k > o:
            k += 1
            pad = 1
        pooled = lax.reduce_window(
            x, neg_inf, lax.max,
            window_dimensions=(1, 1, k, k),
            window_strides=(1, 1, k, k),
            padding=((0, 0), (0, 0), (pad, pad), (pad, pad)))
        outs.append(pooled.reshape(n, -1))
    return jnp.concatenate(outs, axis=1)


if __name__ == "__main__":
    key = jax.random.PRNGKey(0)
    k1, k2 = jax.random.split(key)

    # Config 1: SppModule at small test shapes (in_features = C = 4, small-C
    # fused-lane path).
    x_small = jax.random.normal(k1, (2, 4, 16, 16), dtype=jnp.float32)
    out_small = jax.block_until_ready(spp_module_forward(x_small))
    assert out_small.shape == (2, _NUM_CELLS * 4), out_small.shape
    ref_small = _ref_forward(x_small)
    assert jnp.allclose(out_small, ref_small), float(jnp.max(jnp.abs(out_small - ref_small)))

    # Config 2: lane-dense path at the real SppDenseNet channel count
    # (spp1 runs on the transition1 output, C = 128 -> 7296 features).
    x_dense = jax.random.normal(k2, (16, 128, 16, 16), dtype=jnp.float32)
    out_dense = jax.block_until_ready(spp_module_forward(x_dense))
    assert out_dense.shape == (16, _NUM_CELLS * 128), out_dense.shape
    ref_dense = _ref_forward(x_dense)
    assert jnp.allclose(out_dense, ref_dense), float(jnp.max(jnp.abs(out_dense - ref_dense)))

    print("KERNEL_OK")
</pallas_src>

<mosaic_0001>
module attributes {stable_mosaic.version = 11 : i64} {
  func.func @_spp_kernel(%arg0: i32, %arg1: memref<2x16x64xf32, #tpu.memory_space<vmem>>, %arg2: memref<2x256xf32, #tpu.memory_space<vmem>>) attributes {dimension_semantics = [#tpu.dimension_semantics<parallel>], iteration_bounds = array<i64: 1>, scalar_prefetch = 0 : i64, scratch_operands = 0 : i64, tpu.core_type = #tpu.core_type<tc>, window_params = [{transform_indices = @transform_0, window_bounds = array<i64: 2, 16, 64>}, {transform_indices = @transform_1, window_bounds = array<i64: 2, 256>}]} {
    %c0 = arith.constant 0 : index
    %c0_0 = arith.constant 0 : index
    %c0_1 = arith.constant 0 : index
    %0 = vector.load %arg1[%c0, %c0_0, %c0_1] : memref<2x16x64xf32, #tpu.memory_space<vmem>>, vector<2x1x64xf32>
    %1 = vector.shape_cast %0 : vector<2x1x64xf32> to vector<2x64xf32>
    %c0_2 = arith.constant 0 : index
    %c1 = arith.constant 1 : index
    %c0_3 = arith.constant 0 : index
    %2 = vector.load %arg1[%c0_2, %c1, %c0_3] : memref<2x16x64xf32, #tpu.memory_space<vmem>>, vector<2x1x64xf32>
    %3 = vector.shape_cast %2 : vector<2x1x64xf32> to vector<2x64xf32>
    %4 = arith.maximumf %1, %3 : vector<2x64xf32>
    %c0_4 = arith.constant 0 : index
    %c2 = arith.constant 2 : index
    %c0_5 = arith.constant 0 : index
    %5 = vector.load %arg1[%c0_4, %c2, %c0_5] : memref<2x16x64xf32, #tpu.memory_space<vmem>>, vector<2x1x64xf32>
    %6 = vector.shape_cast %5 : vector<2x1x64xf32> to vector<2x64xf32>
    %7 = arith.maximumf %4, %6 : vector<2x64xf32>
    %c0_6 = arith.constant 0 : index
    %c3 = arith.constant 3 : index
    %c0_7 = arith.constant 0 : index
    %8 = vector.load %arg1[%c0_6, %c3, %c0_7] : memref<2x16x64xf32, #tpu.memory_space<vmem>>, vector<2x1x64xf32>
    %9 = vector.shape_cast %8 : vector<2x1x64xf32> to vector<2x64xf32>
    %10 = arith.maximumf %7, %9 : vector<2x64xf32>
    %c0_8 = arith.constant 0 : index
    %c4 = arith.constant 4 : index
    %c0_9 = arith.constant 0 : index
    %11 = vector.load %arg1[%c0_8, %c4, %c0_9] : memref<2x16x64xf32, #tpu.memory_space<vmem>>, vector<2x1x64xf32>
    %12 = vector.shape_cast %11 : vector<2x1x64xf32> to vector<2x64xf32>
    %13 = arith.maximumf %10, %12 : vector<2x64xf32>
    %c0_10 = arith.constant 0 : index
    %c5 = arith.constant 5 : index
    %c0_11 = arith.constant 0 : index
    %14 = vector.load %arg1[%c0_10, %c5, %c0_11] : memref<2x16x64xf32, #tpu.memory_space<vmem>>, vector<2x1x64xf32>
    %15 = vector.shape_cast %14 : vector<2x1x64xf32> to vector<2x64xf32>
    %16 = arith.maximumf %13, %15 : vector<2x64xf32>
    %c0_12 = arith.constant 0 : index
    %c6 = arith.constant 6 : index
    %c0_13 = arith.constant 0 : index
    %17 = vector.load %arg1[%c0_12, %c6, %c0_13] : memref<2x16x64xf32, #tpu.memory_space<vmem>>, vector<2x1x64xf32>
    %18 = vector.shape_cast %17 : vector<2x1x64xf32> to vector<2x64xf32>
    %19 = arith.maximumf %16, %18 : vector<2x64xf32>
    %c0_14 = arith.constant 0 : index
    %c7 = arith.constant 7 : index
    %c0_15 = arith.constant 0 : index
    %20 = vector.load %arg1[%c0_14, %c7, %c0_15] : memref<2x16x64xf32, #tpu.memory_space<vmem>>, vector<2x1x64xf32>
    %21 = vector.shape_cast %20 : vector<2x1x64xf32> to vector<2x64xf32>
    %22 = arith.maximumf %19, %21 : vector<2x64xf32>
    %c0_16 = arith.constant 0 : index
    %c8 = arith.constant 8 : index
    %c0_17 = arith.constant 0 : index
    %23 = vector.load %arg1[%c0_16, %c8, %c0_17] : memref<2x16x64xf32, #tpu.memory_space<vmem>>, vector<2x1x64xf32>
    %24 = vector.shape_cast %23 : vector<2x1x64xf32> to vector<2x64xf32>
    %25 = arith.maximumf %22, %24 : vector<2x64xf32>
    %c0_18 = arith.constant 0 : index
    %c9 = arith.constant 9 : index
    %c0_19 = arith.constant 0 : index
    %26 = vector.load %arg1[%c0_18, %c9, %c0_19] : memref<2x16x64xf32, #tpu.memory_space<vmem>>, vector<2x1x64xf32>
    %27 = vector.shape_cast %26 : vector<2x1x64xf32> to vector<2x64xf32>
    %28 = arith.maximumf %25, %27 : vector<2x64xf32>
    %c0_20 = arith.constant 0 : index
    %c10 = arith.constant 10 : index
    %c0_21 = arith.constant 0 : index
    %29 = vector.load %arg1[%c0_20, %c10, %c0_21] : memref<2x16x64xf32, #tpu.memory_space<vmem>>, vector<2x1x64xf32>
    %30 = vector.shape_cast %29 : vector<2x1x64xf32> to vector<2x64xf32>
    %31 = arith.maximumf %28, %30 : vector<2x64xf32>
    %c0_22 = arith.constant 0 : index
    %c11 = arith.constant 11 : index
    %c0_23 = arith.constant 0 : index
    %32 = vector.load %arg1[%c0_22, %c11, %c0_23] : memref<2x16x64xf32, #tpu.memory_space<vmem>>, vector<2x1x64xf32>
    %33 = vector.shape_cast %32 : vector<2x1x64xf32> to vector<2x64xf32>
    %34 = arith.maximumf %31, %33 : vector<2x64xf32>
    %c0_24 = arith.constant 0 : index
    %c12 = arith.constant 12 : index
    %c0_25 = arith.constant 0 : index
    %35 = vector.load %arg1[%c0_24, %c12, %c0_25] : memref<2x16x64xf32, #tpu.memory_space<vmem>>, vector<2x1x64xf32>
    %36 = vector.shape_cast %35 : vector<2x1x64xf32> to vector<2x64xf32>
    %37 = arith.maximumf %34, %36 : vector<2x64xf32>
    %c0_26 = arith.constant 0 : index
    %c13 = arith.constant 13 : index
    %c0_27 = arith.constant 0 : index
    %38 = vector.load %arg1[%c0_26, %c13, %c0_27] : memref<2x16x64xf32, #tpu.memory_space<vmem>>, vector<2x1x64xf32>
    %39 = vector.shape_cast %38 : vector<2x1x64xf32> to vector<2x64xf32>
    %40 = arith.maximumf %37, %39 : vector<2x64xf32>
    %c0_28 = arith.constant 0 : index
    %c14 = arith.constant 14 : index
    %c0_29 = arith.constant 0 : index
    %41 = vector.load %arg1[%c0_28, %c14, %c0_29] : memref<2x16x64xf32, #tpu.memory_space<vmem>>, vector<2x1x64xf32>
    %42 = vector.shape_cast %41 : vector<2x1x64xf32> to vector<2x64xf32>
    %43 = arith.maximumf %40, %42 : vector<2x64xf32>
    %c0_30 = arith.constant 0 : index
    %c15 = arith.constant 15 : index
    %c0_31 = arith.constant 0 : index
    %44 = vector.load %arg1[%c0_30, %c15, %c0_31] : memref<2x16x64xf32, #tpu.memory_space<vmem>>, vector<2x1x64xf32>
    %45 = vector.shape_cast %44 : vector<2x1x64xf32> to vector<2x64xf32>
    %46 = arith.maximumf %43, %45 : vector<2x64xf32>
    %47 = vector.extract_strided_slice %46 {offsets = [0, 0], sizes = [2, 4], strides = [1, 1]} : vector<2x64xf32> to vector<2x4xf32>
    %48 = vector.extract_strided_slice %46 {offsets = [0, 4], sizes = [2, 4], strides = [1, 1]} : vector<2x64xf32> to vector<2x4xf32>
    %49 = arith.maximumf %47, %48 : vector<2x4xf32>
    %50 = vector.extract_strided_slice %46 {offsets = [0, 8], sizes = [2, 4], strides = [1, 1]} : vector<2x64xf32> to vector<2x4xf32>
    %51 = arith.maximumf %49, %50 : vector<2x4xf32>
    %52 = vector.extract_strided_slice %46 {offsets = [0, 12], sizes = [2, 4], strides = [1, 1]} : vector<2x64xf32> to vector<2x4xf32>
    %53 = arith.maximumf %51, %52 : vector<2x4xf32>
    %54 = vector.extract_strided_slice %46 {offsets = [0, 16], sizes = [2, 4], strides = [1, 1]} : vector<2x64xf32> to vector<2x4xf32>
    %55 = arith.maximumf %53, %54 : vector<2x4xf32>
    %56 = vector.extract_strided_slice %46 {offsets = [0, 20], sizes = [2, 4], strides = [1, 1]} : vector<2x64xf32> to vector<2x4xf32>
    %57 = arith.maximumf %55, %56 : vector<2x4xf32>
    %58 = vector.extract_strided_slice %46 {offsets = [0, 24], sizes = [2, 4], strides = [1, 1]} : vector<2x64xf32> to vector<2x4xf32>
    %59 = arith.maximumf %57, %58 : vector<2x4xf32>
    %60 = vector.extract_strided_slice %46 {offsets = [0, 28], sizes = [2, 4], strides = [1, 1]} : vector<2x64xf32> to vector<2x4xf32>
    %61 = arith.maximumf %59, %60 : vector<2x4xf32>
    %62 = vector.extract_strided_slice %46 {offsets = [0, 32], sizes = [2, 4], strides = [1, 1]} : vector<2x64xf32> to vector<2x4xf32>
    %63 = arith.maximumf %61, %62 : vector<2x4xf32>
    %64 = vector.extract_strided_slice %46 {offsets = [0, 36], sizes = [2, 4], strides = [1, 1]} : vector<2x64xf32> to vector<2x4xf32>
    %65 = arith.maximumf %63, %64 : vector<2x4xf32>
    %66 = vector.extract_strided_slice %46 {offsets = [0, 40], sizes = [2, 4], strides = [1, 1]} : vector<2x64xf32> to vector<2x4xf32>
    %67 = arith.maximumf %65, %66 : vector<2x4xf32>
    %68 = vector.extract_strided_slice %46 {offsets = [0, 44], sizes = [2, 4], strides = [1, 1]} : vector<2x64xf32> to vector<2x4xf32>
    %69 = arith.maximumf %67, %68 : vector<2x4xf32>
    %70 = vector.extract_strided_slice %46 {offsets = [0, 48], sizes = [2, 4], strides = [1, 1]} : vector<2x64xf32> to vector<2x4xf32>
    %71 = arith.maximumf %69, %70 : vector<2x4xf32>
    %72 = vector.extract_strided_slice %46 {offsets = [0, 52], sizes = [2, 4], strides = [1, 1]} : vector<2x64xf32> to vector<2x4xf32>
    %73 = arith.maximumf %71, %72 : vector<2x4xf32>
    %74 = vector.extract_strided_slice %46 {offsets = [0, 56], sizes = [2, 4], strides = [1, 1]} : vector<2x64xf32> to vector<2x4xf32>
    %75 = arith.maximumf %73, %74 : vector<2x4xf32>
    %76 = vector.extract_strided_slice %46 {offsets = [0, 60], sizes = [2, 4], strides = [1, 1]} : vector<2x64xf32> to vector<2x4xf32>
    %77 = arith.maximumf %75, %76 : vector<2x4xf32>
    %c0_32 = arith.constant 0 : index
    %c0_33 = arith.constant 0 : index
    %c0_34 = arith.constant 0 : index
    %78 = vector.load %arg1[%c0_32, %c0_33, %c0_34] : memref<2x16x64xf32, #tpu.memory_space<vmem>>, vector<2x1x64xf32>
    %79 = vector.shape_cast %78 : vector<2x1x64xf32> to vector<2x64xf32>
    %c0_35 = arith.constant 0 : index
    %c1_36 = arith.constant 1 : index
    %c0_37 = arith.constant 0 : index
    %80 = vector.load %arg1[%c0_35, %c1_36, %c0_37] : memref<2x16x64xf32, #tpu.memory_space<vmem>>, vector<2x1x64xf32>
    %81 = vector.shape_cast %80 : vector<2x1x64xf32> to vector<2x64xf32>
    %82 = arith.maximumf %79, %81 : vector<2x64xf32>
    %c0_38 = arith.constant 0 : index
    %c2_39 = arith.constant 2 : index
    %c0_40 = arith.constant 0 : index
    %83 = vector.load %arg1[%c0_38, %c2_39, %c0_40] : memref<2x16x64xf32, #tpu.memory_space<vmem>>, vector<2x1x64xf32>
    %84 = vector.shape_cast %83 : vector<2x1x64xf32> to vector<2x64xf32>
    %85 = arith.maximumf %82, %84 : vector<2x64xf32>
    %c0_41 = arith.constant 0 : index
    %c3_42 = arith.constant 3 : index
    %c0_43 = arith.constant 0 : index
    %86 = vector.load %arg1[%c0_41, %c3_42, %c0_43] : memref<2x16x64xf32, #tpu.memory_space<vmem>>, vector<2x1x64xf32>
    %87 = vector.shape_cast %86 : vector<2x1x64xf32> to vector<2x64xf32>
    %88 = arith.maximumf %85, %87 : vector<2x64xf32>
    %c0_44 = arith.constant 0 : index
    %c4_45 = arith.constant 4 : index
    %c0_46 = arith.constant 0 : index
    %89 = vector.load %arg1[%c0_44, %c4_45, %c0_46] : memref<2x16x64xf32, #tpu.memory_space<vmem>>, vector<2x1x64xf32>
    %90 = vector.shape_cast %89 : vector<2x1x64xf32> to vector<2x64xf32>
    %91 = arith.maximumf %88, %90 : vector<2x64xf32>
    %c0_47 = arith.constant 0 : index
    %c5_48 = arith.constant 5 : index
    %c0_49 = arith.constant 0 : index
    %92 = vector.load %arg1[%c0_47, %c5_48, %c0_49] : memref<2x16x64xf32, #tpu.memory_space<vmem>>, vector<2x1x64xf32>
    %93 = vector.shape_cast %92 : vector<2x1x64xf32> to vector<2x64xf32>
    %94 = arith.maximumf %91, %93 : vector<2x64xf32>
    %c0_50 = arith.constant 0 : index
    %c6_51 = arith.constant 6 : index
    %c0_52 = arith.constant 0 : index
    %95 = vector.load %arg1[%c0_50, %c6_51, %c0_52] : memref<2x16x64xf32, #tpu.memory_space<vmem>>, vector<2x1x64xf32>
    %96 = vector.shape_cast %95 : vector<2x1x64xf32> to vector<2x64xf32>
    %97 = arith.maximumf %94, %96 : vector<2x64xf32>
    %c0_53 = arith.constant 0 : index
    %c7_54 = arith.constant 7 : index
    %c0_55 = arith.constant 0 : index
    %98 = vector.load %arg1[%c0_53, %c7_54, %c0_55] : memref<2x16x64xf32, #tpu.memory_space<vmem>>, vector<2x1x64xf32>
    %99 = vector.shape_cast %98 : vector<2x1x64xf32> to vector<2x64xf32>
    %100 = arith.maximumf %97, %99 : vector<2x64xf32>
    %101 = vector.extract_strided_slice %100 {offsets = [0, 0], sizes = [2, 4], strides = [1, 1]} : vector<2x64xf32> to vector<2x4xf32>
    %102 = vector.extract_strided_slice %100 {offsets = [0, 4], sizes = [2, 4], strides = [1, 1]} : vector<2x64xf32> to vector<2x4xf32>
    %103 = arith.maximumf %101, %102 : vector<2x4xf32>
    %104 = vector.extract_strided_slice %100 {offsets = [0, 8], sizes = [2, 4], strides = [1, 1]} : vector<2x64xf32> to vector<2x4xf32>
    %105 = arith.maximumf %103, %104 : vector<2x4xf32>
    %106 = vector.extract_strided_slice %100 {offsets = [0, 12], sizes = [2, 4], strides = [1, 1]} : vector<2x64xf32> to vector<2x4xf32>
    %107 = arith.maximumf %105, %106 : vector<2x4xf32>
    %108 = vector.extract_strided_slice %100 {offsets = [0, 16], sizes = [2, 4], strides = [1, 1]} : vector<2x64xf32> to vector<2x4xf32>
    %109 = arith.maximumf %107, %108 : vector<2x4xf32>
    %110 = vector.extract_strided_slice %100 {offsets = [0, 20], sizes = [2, 4], strides = [1, 1]} : vector<2x64xf32> to vector<2x4xf32>
    %111 = arith.maximumf %109, %110 : vector<2x4xf32>
    %112 = vector.extract_strided_slice %100 {offsets = [0, 24], sizes = [2, 4], strides = [1, 1]} : vector<2x64xf32> to vector<2x4xf32>
    %113 = arith.maximumf %111, %112 : vector<2x4xf32>
    %114 = vector.extract_strided_slice %100 {offsets = [0, 28], sizes = [2, 4], strides = [1, 1]} : vector<2x64xf32> to vector<2x4xf32>
    %115 = arith.maximumf %113, %114 : vector<2x4xf32>
    %116 = vector.extract_strided_slice %100 {offsets = [0, 32], sizes = [2, 4], strides = [1, 1]} : vector<2x64xf32> to vector<2x4xf32>
    %117 = vector.extract_strided_slice %100 {offsets = [0, 36], sizes = [2, 4], strides = [1, 1]} : vector<2x64xf32> to vector<2x4xf32>
    %118 = arith.maximumf %116, %117 : vector<2x4xf32>
    %119 = vector.extract_strided_slice %100 {offsets = [0, 40], sizes = [2, 4], strides = [1, 1]} : vector<2x64xf32> to vector<2x4xf32>
    %120 = arith.maximumf %118, %119 : vector<2x4xf32>
    %121 = vector.extract_strided_slice %100 {offsets = [0, 44], sizes = [2, 4], strides = [1, 1]} : vector<2x64xf32> to vector<2x4xf32>
    %122 = arith.maximumf %120, %121 : vector<2x4xf32>
    %123 = vector.extract_strided_slice %100 {offsets = [0, 48], sizes = [2, 4], strides = [1, 1]} : vector<2x64xf32> to vector<2x4xf32>
    %124 = arith.maximumf %122, %123 : vector<2x4xf32>
    %125 = vector.extract_strided_slice %100 {offsets = [0, 52], sizes = [2, 4], strides = [1, 1]} : vector<2x64xf32> to vector<2x4xf32>
    %126 = arith.maximumf %124, %125 : vector<2x4xf32>
    %127 = vector.extract_strided_slice %100 {offsets = [0, 56], sizes = [2, 4], strides = [1, 1]} : vector<2x64xf32> to vector<2x4xf32>
    %128 = arith.maximumf %126, %127 : vector<2x4xf32>
    %129 = vector.extract_strided_slice %100 {offsets = [0, 60], sizes = [2, 4], strides = [1, 1]} : vector<2x64xf32> to vector<2x4xf32>
    %130 = arith.maximumf %128, %129 : vector<2x4xf32>
    %c0_56 = arith.constant 0 : index
    %c8_57 = arith.constant 8 : index
    %c0_58 = arith.constant 0 : index
    %131 = vector.load %arg1[%c0_56, %c8_57, %c0_58] : memref<2x16x64xf32, #tpu.memory_space<vmem>>, vector<2x1x64xf32>
    %132 = vector.shape_cast %131 : vector<2x1x64xf32> to vector<2x64xf32>
    %c0_59 = arith.constant 0 : index
    %c9_60 = arith.constant 9 : index
    %c0_61 = arith.constant 0 : index
    %133 = vector.load %arg1[%c0_59, %c9_60, %c0_61] : memref<2x16x64xf32, #tpu.memory_space<vmem>>, vector<2x1x64xf32>
    %134 = vector.shape_cast %133 : vector<2x1x64xf32> to vector<2x64xf32>
    %135 = arith.maximumf %132, %134 : vector<2x64xf32>
    %c0_62 = arith.constant 0 : index
    %c10_63 = arith.constant 10 : index
    %c0_64 = arith.constant 0 : index
    %136 = vector.load %arg1[%c0_62, %c10_63, %c0_64] : memref<2x16x64xf32, #tpu.memory_space<vmem>>, vector<2x1x64xf32>
    %137 = vector.shape_cast %136 : vector<2x1x64xf32> to vector<2x64xf32>
    %138 = arith.maximumf %135, %137 : vector<2x64xf32>
    %c0_65 = arith.constant 0 : index
    %c11_66 = arith.constant 11 : index
    %c0_67 = arith.constant 0 : index
    %139 = vector.load %arg1[%c0_65, %c11_66, %c0_67] : memref<2x16x64xf32, #tpu.memory_space<vmem>>, vector<2x1x64xf32>
    %140 = vector.shape_cast %139 : vector<2x1x64xf32> to vector<2x64xf32>
    %141 = arith.maximumf %138, %140 : vector<2x64xf32>
    %c0_68 = arith.constant 0 : index
    %c12_69 = arith.constant 12 : index
    %c0_70 = arith.constant 0 : index
    %142 = vector.load %arg1[%c0_68, %c12_69, %c0_70] : memref<2x16x64xf32, #tpu.memory_space<vmem>>, vector<2x1x64xf32>
    %143 = vector.shape_cast %142 : vector<2x1x64xf32> to vector<2x64xf32>
    %144 = arith.maximumf %141, %143 : vector<2x64xf32>
    %c0_71 = arith.constant 0 : index
    %c13_72 = arith.constant 13 : index
    %c0_73 = arith.constant 0 : index
    %145 = vector.load %arg1[%c0_71, %c13_72, %c0_73] : memref<2x16x64xf32, #tpu.memory_space<vmem>>, vector<2x1x64xf32>
    %146 = vector.shape_cast %145 : vector<2x1x64xf32> to vector<2x64xf32>
    %147 = arith.maximumf %144, %146 : vector<2x64xf32>
    %c0_74 = arith.constant 0 : index
    %c14_75 = arith.constant 14 : index
    %c0_76 = arith.constant 0 : index
    %148 = vector.load %arg1[%c0_74, %c14_75, %c0_76] : memref<2x16x64xf32, #tpu.memory_space<vmem>>, vector<2x1x64xf32>
    %149 = vector.shape_cast %148 : vector<2x1x64xf32> to vector<2x64xf32>
    %150 = arith.maximumf %147, %149 : vector<2x64xf32>
    %c0_77 = arith.constant 0 : index
    %c15_78 = arith.constant 15 : index
    %c0_79 = arith.constant 0 : index
    %151 = vector.load %arg1[%c0_77, %c15_78, %c0_79] : memref<2x16x64xf32, #tpu.memory_space<vmem>>, vector<2x1x64xf32>
    %152 = vector.shape_cast %151 : vector<2x1x64xf32> to vector<2x64xf32>
    %153 = arith.maximumf %150, %152 : vector<2x64xf32>
    %154 = vector.extract_strided_slice %153 {offsets = [0, 0], sizes = [2, 4], strides = [1, 1]} : vector<2x64xf32> to vector<2x4xf32>
    %155 = vector.extract_strided_slice %153 {offsets = [0, 4], sizes = [2, 4], strides = [1, 1]} : vector<2x64xf32> to vector<2x4xf32>
    %156 = arith.maximumf %154, %155 : vector<2x4xf32>
    %157 = vector.extract_strided_slice %153 {offsets = [0, 8], sizes = [2, 4], strides = [1, 1]} : vector<2x64xf32> to vector<2x4xf32>
    %158 = arith.maximumf %156, %157 : vector<2x4xf32>
    %159 = vector.extract_strided_slice %153 {offsets = [0, 12], sizes = [2, 4], strides = [1, 1]} : vector<2x64xf32> to vector<2x4xf32>
    %160 = arith.maximumf %158, %159 : vector<2x4xf32>
    %161 = vector.extract_strided_slice %153 {offsets = [0, 16], sizes = [2, 4], strides = [1, 1]} : vector<2x64xf32> to vector<2x4xf32>
    %162 = arith.maximumf %160, %161 : vector<2x4xf32>
    %163 = vector.extract_strided_slice %153 {offsets = [0, 20], sizes = [2, 4], strides = [1, 1]} : vector<2x64xf32> to vector<2x4xf32>
    %164 = arith.maximumf %162, %163 : vector<2x4xf32>
    %165 = vector.extract_strided_slice %153 {offsets = [0, 24], sizes = [2, 4], strides = [1, 1]} : vector<2x64xf32> to vector<2x4xf32>
    %166 = arith.maximumf %164, %165 : vector<2x4xf32>
    %167 = vector.extract_strided_slice %153 {offsets = [0, 28], sizes = [2, 4], strides = [1, 1]} : vector<2x64xf32> to vector<2x4xf32>
    %168 = arith.maximumf %166, %167 : vector<2x4xf32>
    %169 = vector.extract_strided_slice %153 {offsets = [0, 32], sizes = [2, 4], strides = [1, 1]} : vector<2x64xf32> to vector<2x4xf32>
    %170 = vector.extract_strided_slice %153 {offsets = [0, 36], sizes = [2, 4], strides = [1, 1]} : vector<2x64xf32> to vector<2x4xf32>
    %171 = arith.maximumf %169, %170 : vector<2x4xf32>
    %172 = vector.extract_strided_slice %153 {offsets = [0, 40], sizes = [2, 4], strides = [1, 1]} : vector<2x64xf32> to vector<2x4xf32>
    %173 = arith.maximumf %171, %172 : vector<2x4xf32>
    %174 = vector.extract_strided_slice %153 {offsets = [0, 44], sizes = [2, 4], strides = [1, 1]} : vector<2x64xf32> to vector<2x4xf32>
    %175 = arith.maximumf %173, %174 : vector<2x4xf32>
    %176 = vector.extract_strided_slice %153 {offsets = [0, 48], sizes = [2, 4], strides = [1, 1]} : vector<2x64xf32> to vector<2x4xf32>
    %177 = arith.maximumf %175, %176 : vector<2x4xf32>
    %178 = vector.extract_strided_slice %153 {offsets = [0, 52], sizes = [2, 4], strides = [1, 1]} : vector<2x64xf32> to vector<2x4xf32>
    %179 = arith.maximumf %177, %178 : vector<2x4xf32>
    %180 = vector.extract_strided_slice %153 {offsets = [0, 56], sizes = [2, 4], strides = [1, 1]} : vector<2x64xf32> to vector<2x4xf32>
    %181 = arith.maximumf %179, %180 : vector<2x4xf32>
    %182 = vector.extract_strided_slice %153 {offsets = [0, 60], sizes = [2, 4], strides = [1, 1]} : vector<2x64xf32> to vector<2x4xf32>
    %183 = arith.maximumf %181, %182 : vector<2x4xf32>
    %c0_80 = arith.constant 0 : index
    %c0_81 = arith.constant 0 : index
    %c0_82 = arith.constant 0 : index
    %184 = vector.load %arg1[%c0_80, %c0_81, %c0_82] : memref<2x16x64xf32, #tpu.memory_space<vmem>>, vector<2x1x64xf32>
    %185 = vector.shape_cast %184 : vector<2x1x64xf32> to vector<2x64xf32>
    %c0_83 = arith.constant 0 : index
    %c1_84 = arith.constant 1 : index
    %c0_85 = arith.constant 0 : index
    %186 = vector.load %arg1[%c0_83, %c1_84, %c0_85] : memref<2x16x64xf32, #tpu.memory_space<vmem>>, vector<2x1x64xf32>
    %187 = vector.shape_cast %186 : vector<2x1x64xf32> to vector<2x64xf32>
    %188 = arith.maximumf %185, %187 : vector<2x64xf32>
    %c0_86 = arith.constant 0 : index
    %c2_87 = arith.constant 2 : index
    %c0_88 = arith.constant 0 : index
    %189 = vector.load %arg1[%c0_86, %c2_87, %c0_88] : memref<2x16x64xf32, #tpu.memory_space<vmem>>, vector<2x1x64xf32>
    %190 = vector.shape_cast %189 : vector<2x1x64xf32> to vector<2x64xf32>
    %191 = arith.maximumf %188, %190 : vector<2x64xf32>
    %c0_89 = arith.constant 0 : index
    %c3_90 = arith.constant 3 : index
    %c0_91 = arith.constant 0 : index
    %192 = vector.load %arg1[%c0_89, %c3_90, %c0_91] : memref<2x16x64xf32, #tpu.memory_space<vmem>>, vector<2x1x64xf32>
    %193 = vector.shape_cast %192 : vector<2x1x64xf32> to vector<2x64xf32>
    %194 = arith.maximumf %191, %193 : vector<2x64xf32>
    %195 = vector.extract_strided_slice %194 {offsets = [0, 0], sizes = [2, 4], strides = [1, 1]} : vector<2x64xf32> to vector<2x4xf32>
    %196 = vector.extract_strided_slice %194 {offsets = [0, 4], sizes = [2, 4], strides = [1, 1]} : vector<2x64xf32> to vector<2x4xf32>
    %197 = arith.maximumf %195, %196 : vector<2x4xf32>
    %198 = vector.extract_strided_slice %194 {offsets = [0, 8], sizes = [2, 4], strides = [1, 1]} : vector<2x64xf32> to vector<2x4xf32>
    %199 = arith.maximumf %197, %198 : vector<2x4xf32>
    %200 = vector.extract_strided_slice %194 {offsets = [0, 12], sizes = [2, 4], strides = [1, 1]} : vector<2x64xf32> to vector<2x4xf32>
    %201 = arith.maximumf %199, %200 : vector<2x4xf32>
    %202 = vector.extract_strided_slice %194 {offsets = [0, 16], sizes = [2, 4], strides = [1, 1]} : vector<2x64xf32> to vector<2x4xf32>
    %203 = vector.extract_strided_slice %194 {offsets = [0, 20], sizes = [2, 4], strides = [1, 1]} : vector<2x64xf32> to vector<2x4xf32>
    %204 = arith.maximumf %202, %203 : vector<2x4xf32>
    %205 = vector.extract_strided_slice %194 {offsets = [0, 24], sizes = [2, 4], strides = [1, 1]} : vector<2x64xf32> to vector<2x4xf32>
    %206 = arith.maximumf %204, %205 : vector<2x4xf32>
    %207 = vector.extract_strided_slice %194 {offsets = [0, 28], sizes = [2, 4], strides = [1, 1]} : vector<2x64xf32> to vector<2x4xf32>
    %208 = arith.maximumf %206, %207 : vector<2x4xf32>
    %209 = vector.extract_strided_slice %194 {offsets = [0, 32], sizes = [2, 4], strides = [1, 1]} : vector<2x64xf32> to vector<2x4xf32>
    %210 = vector.extract_strided_slice %194 {offsets = [0, 36], sizes = [2, 4], strides = [1, 1]} : vector<2x64xf32> to vector<2x4xf32>
    %211 = arith.maximumf %209, %210 : vector<2x4xf32>
    %212 = vector.extract_strided_slice %194 {offsets = [0, 40], sizes = [2, 4], strides = [1, 1]} : vector<2x64xf32> to vector<2x4xf32>
    %213 = arith.maximumf %211, %212 : vector<2x4xf32>
    %214 = vector.extract_strided_slice %194 {offsets = [0, 44], sizes = [2, 4], strides = [1, 1]} : vector<2x64xf32> to vector<2x4xf32>
    %215 = arith.maximumf %213, %214 : vector<2x4xf32>
    %216 = vector.extract_strided_slice %194 {offsets = [0, 48], sizes = [2, 4], strides = [1, 1]} : vector<2x64xf32> to vector<2x4xf32>
    %217 = vector.extract_strided_slice %194 {offsets = [0, 52], sizes = [2, 4], strides = [1, 1]} : vector<2x64xf32> to vector<2x4xf32>
    %218 = arith.maximumf %216, %217 : vector<2x4xf32>
    %219 = vector.extract_strided_slice %194 {offsets = [0, 56], sizes = [2, 4], strides = [1, 1]} : vector<2x64xf32> to vector<2x4xf32>
    %220 = arith.maximumf %218, %219 : vector<2x4xf32>
    %221 = vector.extract_strided_slice %194 {offsets = [0, 60], sizes = [2, 4], strides = [1, 1]} : vector<2x64xf32> to vector<2x4xf32>
    %222 = arith.maximumf %220, %221 : vector<2x4xf32>
    %c0_92 = arith.constant 0 : index
    %c4_93 = arith.constant 4 : index
    %c0_94 = arith.constant 0 : index
    %223 = vector.load %arg1[%c0_92, %c4_93, %c0_94] : memref<2x16x64xf32, #tpu.memory_space<vmem>>, vector<2x1x64xf32>
    %224 = vector.shape_cast %223 : vector<2x1x64xf32> to vector<2x64xf32>
    %c0_95 = arith.constant 0 : index
    %c5_96 = arith.constant 5 : index
    %c0_97 = arith.constant 0 : index
    %225 = vector.load %arg1[%c0_95, %c5_96, %c0_97] : memref<2x16x64xf32, #tpu.memory_space<vmem>>, vector<2x1x64xf32>
    %226 = vector.shape_cast %225 : vector<2x1x64xf32> to vector<2x64xf32>
    %227 = arith.maximumf %224, %226 : vector<2x64xf32>
    %c0_98 = arith.constant 0 : index
    %c6_99 = arith.constant 6 : index
    %c0_100 = arith.constant 0 : index
    %228 = vector.load %arg1[%c0_98, %c6_99, %c0_100] : memref<2x16x64xf32, #tpu.memory_space<vmem>>, vector<2x1x64xf32>
    %229 = vector.shape_cast %228 : vector<2x1x64xf32> to vector<2x64xf32>
    %230 = arith.maximumf %227, %229 : vector<2x64xf32>
    %c0_101 = arith.constant 0 : index
    %c7_102 = arith.constant 7 : index
    %c0_103 = arith.constant 0 : index
    %231 = vector.load %arg1[%c0_101, %c7_102, %c0_103] : memref<2x16x64xf32, #tpu.memory_space<vmem>>, vector<2x1x64xf32>
    %232 = vector.shape_cast %231 : vector<2x1x64xf32> to vector<2x64xf32>
    %233 = arith.maximumf %230, %232 : vector<2x64xf32>
    %234 = vector.extract_strided_slice %233 {offsets = [0, 0], sizes = [2, 4], strides = [1, 1]} : vector<2x64xf32> to vector<2x4xf32>
    %235 = vector.extract_strided_slice %233 {offsets = [0, 4], sizes = [2, 4], strides = [1, 1]} : vector<2x64xf32> to vector<2x4xf32>
    %236 = arith.maximumf %234, %235 : vector<2x4xf32>
    %237 = vector.extract_strided_slice %233 {offsets = [0, 8], sizes = [2, 4], strides = [1, 1]} : vector<2x64xf32> to vector<2x4xf32>
    %238 = arith.maximumf %236, %237 : vector<2x4xf32>
    %239 = vector.extract_strided_slice %233 {offsets = [0, 12], sizes = [2, 4], strides = [1, 1]} : vector<2x64xf32> to vector<2x4xf32>
    %240 = arith.maximumf %238, %239 : vector<2x4xf32>
    %241 = vector.extract_strided_slice %233 {offsets = [0, 16], sizes = [2, 4], strides = [1, 1]} : vector<2x64xf32> to vector<2x4xf32>
    %242 = vector.extract_strided_slice %233 {offsets = [0, 20], sizes = [2, 4], strides = [1, 1]} : vector<2x64xf32> to vector<2x4xf32>
    %243 = arith.maximumf %241, %242 : vector<2x4xf32>
    %244 = vector.extract_strided_slice %233 {offsets = [0, 24], sizes = [2, 4], strides = [1, 1]} : vector<2x64xf32> to vector<2x4xf32>
    %245 = arith.maximumf %243, %244 : vector<2x4xf32>
    %246 = vector.extract_strided_slice %233 {offsets = [0, 28], sizes = [2, 4], strides = [1, 1]} : vector<2x64xf32> to vector<2x4xf32>
    %247 = arith.maximumf %245, %246 : vector<2x4xf32>
    %248 = vector.extract_strided_slice %233 {offsets = [0, 32], sizes = [2, 4], strides = [1, 1]} : vector<2x64xf32> to vector<2x4xf32>
    %249 = vector.extract_strided_slice %233 {offsets = [0, 36], sizes = [2, 4], strides = [1, 1]} : vector<2x64xf32> to vector<2x4xf32>
    %250 = arith.maximumf %248, %249 : vector<2x4xf32>
    %251 = vector.extract_strided_slice %233 {offsets = [0, 40], sizes = [2, 4], strides = [1, 1]} : vector<2x64xf32> to vector<2x4xf32>
    %252 = arith.maximumf %250, %251 : vector<2x4xf32>
    %253 = vector.extract_strided_slice %233 {offsets = [0, 44], sizes = [2, 4], strides = [1, 1]} : vector<2x64xf32> to vector<2x4xf32>
    %254 = arith.maximumf %252, %253 : vector<2x4xf32>
    %255 = vector.extract_strided_slice %233 {offsets = [0, 48], sizes = [2, 4], strides = [1, 1]} : vector<2x64xf32> to vector<2x4xf32>
    %256 = vector.extract_strided_slice %233 {offsets = [0, 52], sizes = [2, 4], strides = [1, 1]} : vector<2x64xf32> to vector<2x4xf32>
    %257 = arith.maximumf %255, %256 : vector<2x4xf32>
    %258 = vector.extract_strided_slice %233 {offsets = [0, 56], sizes = [2, 4], strides = [1, 1]} : vector<2x64xf32> to vector<2x4xf32>
    %259 = arith.maximumf %257, %258 : vector<2x4xf32>
    %260 = vector.extract_strided_slice %233 {offsets = [0, 60], sizes = [2, 4], strides = [1, 1]} : vector<2x64xf32> to vector<2x4xf32>
    %261 = arith.maximumf %259, %260 : vector<2x4xf32>
    %c0_104 = arith.constant 0 : index
    %c8_105 = arith.constant 8 : index
    %c0_106 = arith.constant 0 : index
    %262 = vector.load %arg1[%c0_104, %c8_105, %c0_106] : memref<2x16x64xf32, #tpu.memory_space<vmem>>, vector<2x1x64xf32>
    %263 = vector.shape_cast %262 : vector<2x1x64xf32> to vector<2x64xf32>
    %c0_107 = arith.constant 0 : index
    %c9_108 = arith.constant 9 : index
    %c0_109 = arith.constant 0 : index
    %264 = vector.load %arg1[%c0_107, %c9_108, %c0_109] : memref<2x16x64xf32, #tpu.memory_space<vmem>>, vector<2x1x64xf32>
    %265 = vector.shape_cast %264 : vector<2x1x64xf32> to vector<2x64xf32>
    %266 = arith.maximumf %263, %265 : vector<2x64xf32>
    %c0_110 = arith.constant 0 : index
    %c10_111 = arith.constant 10 : index
    %c0_112 = arith.constant 0 : index
    %267 = vector.load %arg1[%c0_110, %c10_111, %c0_112] : memref<2x16x64xf32, #tpu.memory_space<vmem>>, vector<2x1x64xf32>
    %268 = vector.shape_cast %267 : vector<2x1x64xf32> to vector<2x64xf32>
    %269 = arith.maximumf %266, %268 : vector<2x64xf32>
    %c0_113 = arith.constant 0 : index
    %c11_114 = arith.constant 11 : index
    %c0_115 = arith.constant 0 : index
    %270 = vector.load %arg1[%c0_113, %c11_114, %c0_115] : memref<2x16x64xf32, #tpu.memory_space<vmem>>, vector<2x1x64xf32>
    %271 = vector.shape_cast %270 : vector<2x1x64xf32> to vector<2x64xf32>
    %272 = arith.maximumf %269, %271 : vector<2x64xf32>
    %273 = vector.extract_strided_slice %272 {offsets = [0, 0], sizes = [2, 4], strides = [1, 1]} : vector<2x64xf32> to vector<2x4xf32>
    %274 = vector.extract_strided_slice %272 {offsets = [0, 4], sizes = [2, 4], strides = [1, 1]} : vector<2x64xf32> to vector<2x4xf32>
    %275 = arith.maximumf %273, %274 : vector<2x4xf32>
    %276 = vector.extract_strided_slice %272 {offsets = [0, 8], sizes = [2, 4], strides = [1, 1]} : vector<2x64xf32> to vector<2x4xf32>
    %277 = arith.maximumf %275, %276 : vector<2x4xf32>
    %278 = vector.extract_strided_slice %272 {offsets = [0, 12], sizes = [2, 4], strides = [1, 1]} : vector<2x64xf32> to vector<2x4xf32>
    %279 = arith.maximumf %277, %278 : vector<2x4xf32>
    %280 = vector.extract_strided_slice %272 {offsets = [0, 16], sizes = [2, 4], strides = [1, 1]} : vector<2x64xf32> to vector<2x4xf32>
    %281 = vector.extract_strided_slice %272 {offsets = [0, 20], sizes = [2, 4], strides = [1, 1]} : vector<2x64xf32> to vector<2x4xf32>
    %282 = arith.maximumf %280, %281 : vector<2x4xf32>
    %283 = vector.extract_strided_slice %272 {offsets = [0, 24], sizes = [2, 4], strides = [1, 1]} : vector<2x64xf32> to vector<2x4xf32>
    %284 = arith.maximumf %282, %283 : vector<2x4xf32>
    %285 = vector.extract_strided_slice %272 {offsets = [0, 28], sizes = [2, 4], strides = [1, 1]} : vector<2x64xf32> to vector<2x4xf32>
    %286 = arith.maximumf %284, %285 : vector<2x4xf32>
    %287 = vector.extract_strided_slice %272 {offsets = [0, 32], sizes = [2, 4], strides = [1, 1]} : vector<2x64xf32> to vector<2x4xf32>
    %288 = vector.extract_strided_slice %272 {offsets = [0, 36], sizes = [2, 4], strides = [1, 1]} : vector<2x64xf32> to vector<2x4xf32>
    %289 = arith.maximumf %287, %288 : vector<2x4xf32>
    %290 = vector.extract_strided_slice %272 {offsets = [0, 40], sizes = [2, 4], strides = [1, 1]} : vector<2x64xf32> to vector<2x4xf32>
    %291 = arith.maximumf %289, %290 : vector<2x4xf32>
    %292 = vector.extract_strided_slice %272 {offsets = [0, 44], sizes = [2, 4], strides = [1, 1]} : vector<2x64xf32> to vector<2x4xf32>
    %293 = arith.maximumf %291, %292 : vector<2x4xf32>
    %294 = vector.extract_strided_slice %272 {offsets = [0, 48], sizes = [2, 4], strides = [1, 1]} : vector<2x64xf32> to vector<2x4xf32>
    %295 = vector.extract_strided_slice %272 {offsets = [0, 52], sizes = [2, 4], strides = [1, 1]} : vector<2x64xf32> to vector<2x4xf32>
    %296 = arith.maximumf %294, %295 : vector<2x4xf32>
    %297 = vector.extract_strided_slice %272 {offsets = [0, 56], sizes = [2, 4], strides = [1, 1]} : vector<2x64xf32> to vector<2x4xf32>
    %298 = arith.maximumf %296, %297 : vector<2x4xf32>
    %299 = vector.extract_strided_slice %272 {offsets = [0, 60], sizes = [2, 4], strides = [1, 1]} : vector<2x64xf32> to vector<2x4xf32>
    %300 = arith.maximumf %298, %299 : vector<2x4xf32>
    %c0_116 = arith.constant 0 : index
    %c12_117 = arith.constant 12 : index
    %c0_118 = arith.constant 0 : index
    %301 = vector.load %arg1[%c0_116, %c12_117, %c0_118] : memref<2x16x64xf32, #tpu.memory_space<vmem>>, vector<2x1x64xf32>
    %302 = vector.shape_cast %301 : vector<2x1x64xf32> to vector<2x64xf32>
    %c0_119 = arith.constant 0 : index
    %c13_120 = arith.constant 13 : index
    %c0_121 = arith.constant 0 : index
    %303 = vector.load %arg1[%c0_119, %c13_120, %c0_121] : memref<2x16x64xf32, #tpu.memory_space<vmem>>, vector<2x1x64xf32>
    %304 = vector.shape_cast %303 : vector<2x1x64xf32> to vector<2x64xf32>
    %305 = arith.maximumf %302, %304 : vector<2x64xf32>
    %c0_122 = arith.constant 0 : index
    %c14_123 = arith.constant 14 : index
    %c0_124 = arith.constant 0 : index
    %306 = vector.load %arg1[%c0_122, %c14_123, %c0_124] : memref<2x16x64xf32, #tpu.memory_space<vmem>>, vector<2x1x64xf32>
    %307 = vector.shape_cast %306 : vector<2x1x64xf32> to vector<2x64xf32>
    %308 = arith.maximumf %305, %307 : vector<2x64xf32>
    %c0_125 = arith.constant 0 : index
    %c15_126 = arith.constant 15 : index
    %c0_127 = arith.constant 0 : index
    %309 = vector.load %arg1[%c0_125, %c15_126, %c0_127] : memref<2x16x64xf32, #tpu.memory_space<vmem>>, vector<2x1x64xf32>
    %310 = vector.shape_cast %309 : vector<2x1x64xf32> to vector<2x64xf32>
    %311 = arith.maximumf %308, %310 : vector<2x64xf32>
    %312 = vector.extract_strided_slice %311 {offsets = [0, 0], sizes = [2, 4], strides = [1, 1]} : vector<2x64xf32> to vector<2x4xf32>
    %313 = vector.extract_strided_slice %311 {offsets = [0, 4], sizes = [2, 4], strides = [1, 1]} : vector<2x64xf32> to vector<2x4xf32>
    %314 = arith.maximumf %312, %313 : vector<2x4xf32>
    %315 = vector.extract_strided_slice %311 {offsets = [0, 8], sizes = [2, 4], strides = [1, 1]} : vector<2x64xf32> to vector<2x4xf32>
    %316 = arith.maximumf %314, %315 : vector<2x4xf32>
    %317 = vector.extract_strided_slice %311 {offsets = [0, 12], sizes = [2, 4], strides = [1, 1]} : vector<2x64xf32> to vector<2x4xf32>
    %318 = arith.maximumf %316, %317 : vector<2x4xf32>
    %319 = vector.extract_strided_slice %311 {offsets = [0, 16], sizes = [2, 4], strides = [1, 1]} : vector<2x64xf32> to vector<2x4xf32>
    %320 = vector.extract_strided_slice %311 {offsets = [0, 20], sizes = [2, 4], strides = [1, 1]} : vector<2x64xf32> to vector<2x4xf32>
    %321 = arith.maximumf %319, %320 : vector<2x4xf32>
    %322 = vector.extract_strided_slice %311 {offsets = [0, 24], sizes = [2, 4], strides = [1, 1]} : vector<2x64xf32> to vector<2x4xf32>
    %323 = arith.maximumf %321, %322 : vector<2x4xf32>
    %324 = vector.extract_strided_slice %311 {offsets = [0, 28], sizes = [2, 4], strides = [1, 1]} : vector<2x64xf32> to vector<2x4xf32>
    %325 = arith.maximumf %323, %324 : vector<2x4xf32>
    %326 = vector.extract_strided_slice %311 {offsets = [0, 32], sizes = [2, 4], strides = [1, 1]} : vector<2x64xf32> to vector<2x4xf32>
    %327 = vector.extract_strided_slice %311 {offsets = [0, 36], sizes = [2, 4], strides = [1, 1]} : vector<2x64xf32> to vector<2x4xf32>
    %328 = arith.maximumf %326, %327 : vector<2x4xf32>
    %329 = vector.extract_strided_slice %311 {offsets = [0, 40], sizes = [2, 4], strides = [1, 1]} : vector<2x64xf32> to vector<2x4xf32>
    %330 = arith.maximumf %328, %329 : vector<2x4xf32>
    %331 = vector.extract_strided_slice %311 {offsets = [0, 44], sizes = [2, 4], strides = [1, 1]} : vector<2x64xf32> to vector<2x4xf32>
    %332 = arith.maximumf %330, %331 : vector<2x4xf32>
    %333 = vector.extract_strided_slice %311 {offsets = [0, 48], sizes = [2, 4], strides = [1, 1]} : vector<2x64xf32> to vector<2x4xf32>
    %334 = vector.extract_strided_slice %311 {offsets = [0, 52], sizes = [2, 4], strides = [1, 1]} : vector<2x64xf32> to vector<2x4xf32>
    %335 = arith.maximumf %333, %334 : vector<2x4xf32>
    %336 = vector.extract_strided_slice %311 {offsets = [0, 56], sizes = [2, 4], strides = [1, 1]} : vector<2x64xf32> to vector<2x4xf32>
    %337 = arith.maximumf %335, %336 : vector<2x4xf32>
    %338 = vector.extract_strided_slice %311 {offsets = [0, 60], sizes = [2, 4], strides = [1, 1]} : vector<2x64xf32> to vector<2x4xf32>
    %339 = arith.maximumf %337, %338 : vector<2x4xf32>
    %c0_128 = arith.constant 0 : index
    %c0_129 = arith.constant 0 : index
    %c0_130 = arith.constant 0 : index
    %340 = vector.load %arg1[%c0_128, %c0_129, %c0_130] : memref<2x16x64xf32, #tpu.memory_space<vmem>>, vector<2x1x64xf32>
    %341 = vector.shape_cast %340 : vector<2x1x64xf32> to vector<2x64xf32>
    %c0_131 = arith.constant 0 : index
    %c1_132 = arith.constant 1 : index
    %c0_133 = arith.constant 0 : index
    %342 = vector.load %arg1[%c0_131, %c1_132, %c0_133] : memref<2x16x64xf32, #tpu.memory_space<vmem>>, vector<2x1x64xf32>
    %343 = vector.shape_cast %342 : vector<2x1x64xf32> to vector<2x64xf32>
    %344 = arith.maximumf %341, %343 : vector<2x64xf32>
    %345 = vector.extract_strided_slice %344 {offsets = [0, 0], sizes = [2, 4], strides = [1, 1]} : vector<2x64xf32> to vector<2x4xf32>
    %346 = vector.extract_strided_slice %344 {offsets = [0, 4], sizes = [2, 4], strides = [1, 1]} : vector<2x64xf32> to vector<2x4xf32>
    %347 = arith.maximumf %345, %346 : vector<2x4xf32>
    %348 = vector.extract_strided_slice %344 {offsets = [0, 8], sizes = [2, 4], strides = [1, 1]} : vector<2x64xf32> to vector<2x4xf32>
    %349 = vector.extract_strided_slice %344 {offsets = [0, 12], sizes = [2, 4], strides = [1, 1]} : vector<2x64xf32> to vector<2x4xf32>
    %350 = arith.maximumf %348, %349 : vector<2x4xf32>
    %351 = vector.extract_strided_slice %344 {offsets = [0, 16], sizes = [2, 4], strides = [1, 1]} : vector<2x64xf32> to vector<2x4xf32>
    %352 = arith.maximumf %350, %351 : vector<2x4xf32>
    %353 = vector.extract_strided_slice %344 {offsets = [0, 20], sizes = [2, 4], strides = [1, 1]} : vector<2x64xf32> to vector<2x4xf32>
    %354 = vector.extract_strided_slice %344 {offsets = [0, 24], sizes = [2, 4], strides = [1, 1]} : vector<2x64xf32> to vector<2x4xf32>
    %355 = arith.maximumf %353, %354 : vector<2x4xf32>
    %356 = vector.extract_strided_slice %344 {offsets = [0, 28], sizes = [2, 4], strides = [1, 1]} : vector<2x64xf32> to vector<2x4xf32>
    %357 = arith.maximumf %355, %356 : vector<2x4xf32>
    %358 = vector.extract_strided_slice %344 {offsets = [0, 32], sizes = [2, 4], strides = [1, 1]} : vector<2x64xf32> to vector<2x4xf32>
    %359 = vector.extract_strided_slice %344 {offsets = [0, 36], sizes = [2, 4], strides = [1, 1]} : vector<2x64xf32> to vector<2x4xf32>
    %360 = arith.maximumf %358, %359 : vector<2x4xf32>
    %361 = vector.extract_strided_slice %344 {offsets = [0, 40], sizes = [2, 4], strides = [1, 1]} : vector<2x64xf32> to vector<2x4xf32>
    %362 = arith.maximumf %360, %361 : vector<2x4xf32>
    %363 = vector.extract_strided_slice %344 {offsets = [0, 44], sizes = [2, 4], strides = [1, 1]} : vector<2x64xf32> to vector<2x4xf32>
    %364 = vector.extract_strided_slice %344 {offsets = [0, 48], sizes = [2, 4], strides = [1, 1]} : vector<2x64xf32> to vector<2x4xf32>
    %365 = arith.maximumf %363, %364 : vector<2x4xf32>
    %366 = vector.extract_strided_slice %344 {offsets = [0, 52], sizes = [2, 4], strides = [1, 1]} : vector<2x64xf32> to vector<2x4xf32>
    %367 = arith.maximumf %365, %366 : vector<2x4xf32>
    %368 = vector.extract_strided_slice %344 {offsets = [0, 56], sizes = [2, 4], strides = [1, 1]} : vector<2x64xf32> to vector<2x4xf32>
    %369 = vector.extract_strided_slice %344 {offsets = [0, 60], sizes = [2, 4], strides = [1, 1]} : vector<2x64xf32> to vector<2x4xf32>
    %370 = arith.maximumf %368, %369 : vector<2x4xf32>
    %c0_134 = arith.constant 0 : index
    %c2_135 = arith.constant 2 : index
    %c0_136 = arith.constant 0 : index
    %371 = vector.load %arg1[%c0_134, %c2_135, %c0_136] : memref<2x16x64xf32, #tpu.memory_space<vmem>>, vector<2x1x64xf32>
    %372 = vector.shape_cast %371 : vector<2x1x64xf32> to vector<2x64xf32>
    %c0_137 = arith.constant 0 : index
    %c3_138 = arith.constant 3 : index
    %c0_139 = arith.constant 0 : index
    %373 = vector.load %arg1[%c0_137, %c3_138, %c0_139] : memref<2x16x64xf32, #tpu.memory_space<vmem>>, vector<2x1x64xf32>
    %374 = vector.shape_cast %373 : vector<2x1x64xf32> to vector<2x64xf32>
    %375 = arith.maximumf %372, %374 : vector<2x64xf32>
    %c0_140 = arith.constant 0 : index
    %c4_141 = arith.constant 4 : index
    %c0_142 = arith.constant 0 : index
    %376 = vector.load %arg1[%c0_140, %c4_141, %c0_142] : memref<2x16x64xf32, #tpu.memory_space<vmem>>, vector<2x1x64xf32>
    %377 = vector.shape_cast %376 : vector<2x1x64xf32> to vector<2x64xf32>
    %378 = arith.maximumf %375, %377 : vector<2x64xf32>
    %379 = vector.extract_strided_slice %378 {offsets = [0, 0], sizes = [2, 4], strides = [1, 1]} : vector<2x64xf32> to vector<2x4xf32>
    %380 = vector.extract_strided_slice %378 {offsets = [0, 4], sizes = [2, 4], strides = [1, 1]} : vector<2x64xf32> to vector<2x4xf32>
    %381 = arith.maximumf %379, %380 : vector<2x4xf32>
    %382 = vector.extract_strided_slice %378 {offsets = [0, 8], sizes = [2, 4], strides = [1, 1]} : vector<2x64xf32> to vector<2x4xf32>
    %383 = vector.extract_strided_slice %378 {offsets = [0, 12], sizes = [2, 4], strides = [1, 1]} : vector<2x64xf32> to vector<2x4xf32>
    %384 = arith.maximumf %382, %383 : vector<2x4xf32>
    %385 = vector.extract_strided_slice %378 {offsets = [0, 16], sizes = [2, 4], strides = [1, 1]} : vector<2x64xf32> to vector<2x4xf32>
    %386 = arith.maximumf %384, %385 : vector<2x4xf32>
    %387 = vector.extract_strided_slice %378 {offsets = [0, 20], sizes = [2, 4], strides = [1, 1]} : vector<2x64xf32> to vector<2x4xf32>
    %388 = vector.extract_strided_slice %378 {offsets = [0, 24], sizes = [2, 4], strides = [1, 1]} : vector<2x64xf32> to vector<2x4xf32>
    %389 = arith.maximumf %387, %388 : vector<2x4xf32>
    %390 = vector.extract_strided_slice %378 {offsets = [0, 28], sizes = [2, 4], strides = [1, 1]} : vector<2x64xf32> to vector<2x4xf32>
    %391 = arith.maximumf %389, %390 : vector<2x4xf32>
    %392 = vector.extract_strided_slice %378 {offsets = [0, 32], sizes = [2, 4], strides = [1, 1]} : vector<2x64xf32> to vector<2x4xf32>
    %393 = vector.extract_strided_slice %378 {offsets = [0, 36], sizes = [2, 4], strides = [1, 1]} : vector<2x64xf32> to vector<2x4xf32>
    %394 = arith.maximumf %392, %393 : vector<2x4xf32>
    %395 = vector.extract_strided_slice %378 {offsets = [0, 40], sizes = [2, 4], strides = [1, 1]} : vector<2x64xf32> to vector<2x4xf32>
    %396 = arith.maximumf %394, %395 : vector<2x4xf32>
    %397 = vector.extract_strided_slice %378 {offsets = [0, 44], sizes = [2, 4], strides = [1, 1]} : vector<2x64xf32> to vector<2x4xf32>
    %398 = vector.extract_strided_slice %378 {offsets = [0, 48], sizes = [2, 4], strides = [1, 1]} : vector<2x64xf32> to vector<2x4xf32>
    %399 = arith.maximumf %397, %398 : vector<2x4xf32>
    %400 = vector.extract_strided_slice %378 {offsets = [0, 52], sizes = [2, 4], strides = [1, 1]} : vector<2x64xf32> to vector<2x4xf32>
    %401 = arith.maximumf %399, %400 : vector<2x4xf32>
    %402 = vector.extract_strided_slice %378 {offsets = [0, 56], sizes = [2, 4], strides = [1, 1]} : vector<2x64xf32> to vector<2x4xf32>
    %403 = vector.extract_strided_slice %378 {offsets = [0, 60], sizes = [2, 4], strides = [1, 1]} : vector<2x64xf32> to vector<2x4xf32>
    %404 = arith.maximumf %402, %403 : vector<2x4xf32>
    %c0_143 = arith.constant 0 : index
    %c5_144 = arith.constant 5 : index
    %c0_145 = arith.constant 0 : index
    %405 = vector.load %arg1[%c0_143, %c5_144, %c0_145] : memref<2x16x64xf32, #tpu.memory_space<vmem>>, vector<2x1x64xf32>
    %406 = vector.shape_cast %405 : vector<2x1x64xf32> to vector<2x64xf32>
    %c0_146 = arith.constant 0 : index
    %c6_147 = arith.constant 6 : index
    %c0_148 = arith.constant 0 : index
    %407 = vector.load %arg1[%c0_146, %c6_147, %c0_148] : memref<2x16x64xf32, #tpu.memory_space<vmem>>, vector<2x1x64xf32>
    %408 = vector.shape_cast %407 : vector<2x1x64xf32> to vector<2x64xf32>
    %409 = arith.maximumf %406, %408 : vector<2x64xf32>
    %c0_149 = arith.constant 0 : index
    %c7_150 = arith.constant 7 : index
    %c0_151 = arith.constant 0 : index
    %410 = vector.load %arg1[%c0_149, %c7_150, %c0_151] : memref<2x16x64xf32, #tpu.memory_space<vmem>>, vector<2x1x64xf32>
    %411 = vector.shape_cast %410 : vector<2x1x64xf32> to vector<2x64xf32>
    %412 = arith.maximumf %409, %411 : vector<2x64xf32>
    %413 = vector.extract_strided_slice %412 {offsets = [0, 0], sizes = [2, 4], strides = [1, 1]} : vector<2x64xf32> to vector<2x4xf32>
    %414 = vector.extract_strided_slice %412 {offsets = [0, 4], sizes = [2, 4], strides = [1, 1]} : vector<2x64xf32> to vector<2x4xf32>
    %415 = arith.maximumf %413, %414 : vector<2x4xf32>
    %416 = vector.extract_strided_slice %412 {offsets = [0, 8], sizes = [2, 4], strides = [1, 1]} : vector<2x64xf32> to vector<2x4xf32>
    %417 = vector.extract_strided_slice %412 {offsets = [0, 12], sizes = [2, 4], strides = [1, 1]} : vector<2x64xf32> to vector<2x4xf32>
    %418 = arith.maximumf %416, %417 : vector<2x4xf32>
    %419 = vector.extract_strided_slice %412 {offsets = [0, 16], sizes = [2, 4], strides = [1, 1]} : vector<2x64xf32> to vector<2x4xf32>
    %420 = arith.maximumf %418, %419 : vector<2x4xf32>
    %421 = vector.extract_strided_slice %412 {offsets = [0, 20], sizes = [2, 4], strides = [1, 1]} : vector<2x64xf32> to vector<2x4xf32>
    %422 = vector.extract_strided_slice %412 {offsets = [0, 24], sizes = [2, 4], strides = [1, 1]} : vector<2x64xf32> to vector<2x4xf32>
    %423 = arith.maximumf %421, %422 : vector<2x4xf32>
    %424 = vector.extract_strided_slice %412 {offsets = [0, 28], sizes = [2, 4], strides = [1, 1]} : vector<2x64xf32> to vector<2x4xf32>
    %425 = arith.maximumf %423, %424 : vector<2x4xf32>
    %426 = vector.extract_strided_slice %412 {offsets = [0, 32], sizes = [2, 4], strides = [1, 1]} : vector<2x64xf32> to vector<2x4xf32>
    %427 = vector.extract_strided_slice %412 {offsets = [0, 36], sizes = [2, 4], strides = [1, 1]} : vector<2x64xf32> to vector<2x4xf32>
    %428 = arith.maximumf %426, %427 : vector<2x4xf32>
    %429 = vector.extract_strided_slice %412 {offsets = [0, 40], sizes = [2, 4], strides = [1, 1]} : vector<2x64xf32> to vector<2x4xf32>
    %430 = arith.maximumf %428, %429 : vector<2x4xf32>
    %431 = vector.extract_strided_slice %412 {offsets = [0, 44], sizes = [2, 4], strides = [1, 1]} : vector<2x64xf32> to vector<2x4xf32>
    %432 = vector.extract_strided_slice %412 {offsets = [0, 48], sizes = [2, 4], strides = [1, 1]} : vector<2x64xf32> to vector<2x4xf32>
    %433 = arith.maximumf %431, %432 : vector<2x4xf32>
    %434 = vector.extract_strided_slice %412 {offsets = [0, 52], sizes = [2, 4], strides = [1, 1]} : vector<2x64xf32> to vector<2x4xf32>
    %435 = arith.maximumf %433, %434 : vector<2x4xf32>
    %436 = vector.extract_strided_slice %412 {offsets = [0, 56], sizes = [2, 4], strides = [1, 1]} : vector<2x64xf32> to vector<2x4xf32>
    %437 = vector.extract_strided_slice %412 {offsets = [0, 60], sizes = [2, 4], strides = [1, 1]} : vector<2x64xf32> to vector<2x4xf32>
    %438 = arith.maximumf %436, %437 : vector<2x4xf32>
    %c0_152 = arith.constant 0 : index
    %c8_153 = arith.constant 8 : index
    %c0_154 = arith.constant 0 : index
    %439 = vector.load %arg1[%c0_152, %c8_153, %c0_154] : memref<2x16x64xf32, #tpu.memory_space<vmem>>, vector<2x1x64xf32>
    %440 = vector.shape_cast %439 : vector<2x1x64xf32> to vector<2x64xf32>
    %c0_155 = arith.constant 0 : index
    %c9_156 = arith.constant 9 : index
    %c0_157 = arith.constant 0 : index
    %441 = vector.load %arg1[%c0_155, %c9_156, %c0_157] : memref<2x16x64xf32, #tpu.memory_space<vmem>>, vector<2x1x64xf32>
    %442 = vector.shape_cast %441 : vector<2x1x64xf32> to vector<2x64xf32>
    %443 = arith.maximumf %440, %442 : vector<2x64xf32>
    %c0_158 = arith.constant 0 : index
    %c10_159 = arith.constant 10 : index
    %c0_160 = arith.constant 0 : index
    %444 = vector.load %arg1[%c0_158, %c10_159, %c0_160] : memref<2x16x64xf32, #tpu.memory_space<vmem>>, vector<2x1x64xf32>
    %445 = vector.shape_cast %444 : vector<2x1x64xf32> to vector<2x64xf32>
    %446 = arith.maximumf %443, %445 : vector<2x64xf32>
    %447 = vector.extract_strided_slice %446 {offsets = [0, 0], sizes = [2, 4], strides = [1, 1]} : vector<2x64xf32> to vector<2x4xf32>
    %448 = vector.extract_strided_slice %446 {offsets = [0, 4], sizes = [2, 4], strides = [1, 1]} : vector<2x64xf32> to vector<2x4xf32>
    %449 = arith.maximumf %447, %448 : vector<2x4xf32>
    %450 = vector.extract_strided_slice %446 {offsets = [0, 8], sizes = [2, 4], strides = [1, 1]} : vector<2x64xf32> to vector<2x4xf32>
    %451 = vector.extract_strided_slice %446 {offsets = [0, 12], sizes = [2, 4], strides = [1, 1]} : vector<2x64xf32> to vector<2x4xf32>
    %452 = arith.maximumf %450, %451 : vector<2x4xf32>
    %453 = vector.extract_strided_slice %446 {offsets = [0, 16], sizes = [2, 4], strides = [1, 1]} : vector<2x64xf32> to vector<2x4xf32>
    %454 = arith.maximumf %452, %453 : vector<2x4xf32>
    %455 = vector.extract_strided_slice %446 {offsets = [0, 20], sizes = [2, 4], strides = [1, 1]} : vector<2x64xf32> to vector<2x4xf32>
    %456 = vector.extract_strided_slice %446 {offsets = [0, 24], sizes = [2, 4], strides = [1, 1]} : vector<2x64xf32> to vector<2x4xf32>
    %457 = arith.maximumf %455, %456 : vector<2x4xf32>
    %458 = vector.extract_strided_slice %446 {offsets = [0, 28], sizes = [2, 4], strides = [1, 1]} : vector<2x64xf32> to vector<2x4xf32>
    %459 = arith.maximumf %457, %458 : vector<2x4xf32>
    %460 = vector.extract_strided_slice %446 {offsets = [0, 32], sizes = [2, 4], strides = [1, 1]} : vector<2x64xf32> to vector<2x4xf32>
    %461 = vector.extract_strided_slice %446 {offsets = [0, 36], sizes = [2, 4], strides = [1, 1]} : vector<2x64xf32> to vector<2x4xf32>
    %462 = arith.maximumf %460, %461 : vector<2x4xf32>
    %463 = vector.extract_strided_slice %446 {offsets = [0, 40], sizes = [2, 4], strides = [1, 1]} : vector<2x64xf32> to vector<2x4xf32>
    %464 = arith.maximumf %462, %463 : vector<2x4xf32>
    %465 = vector.extract_strided_slice %446 {offsets = [0, 44], sizes = [2, 4], strides = [1, 1]} : vector<2x64xf32> to vector<2x4xf32>
    %466 = vector.extract_strided_slice %446 {offsets = [0, 48], sizes = [2, 4], strides = [1, 1]} : vector<2x64xf32> to vector<2x4xf32>
    %467 = arith.maximumf %465, %466 : vector<2x4xf32>
    %468 = vector.extract_strided_slice %446 {offsets = [0, 52], sizes = [2, 4], strides = [1, 1]} : vector<2x64xf32> to vector<2x4xf32>
    %469 = arith.maximumf %467, %468 : vector<2x4xf32>
    %470 = vector.extract_strided_slice %446 {offsets = [0, 56], sizes = [2, 4], strides = [1, 1]} : vector<2x64xf32> to vector<2x4xf32>
    %471 = vector.extract_strided_slice %446 {offsets = [0, 60], sizes = [2, 4], strides = [1, 1]} : vector<2x64xf32> to vector<2x4xf32>
    %472 = arith.maximumf %470, %471 : vector<2x4xf32>
    %c0_161 = arith.constant 0 : index
    %c11_162 = arith.constant 11 : index
    %c0_163 = arith.constant 0 : index
    %473 = vector.load %arg1[%c0_161, %c11_162, %c0_163] : memref<2x16x64xf32, #tpu.memory_space<vmem>>, vector<2x1x64xf32>
    %474 = vector.shape_cast %473 : vector<2x1x64xf32> to vector<2x64xf32>
    %c0_164 = arith.constant 0 : index
    %c12_165 = arith.constant 12 : index
    %c0_166 = arith.constant 0 : index
    %475 = vector.load %arg1[%c0_164, %c12_165, %c0_166] : memref<2x16x64xf32, #tpu.memory_space<vmem>>, vector<2x1x64xf32>
    %476 = vector.shape_cast %475 : vector<2x1x64xf32> to vector<2x64xf32>
    %477 = arith.maximumf %474, %476 : vector<2x64xf32>
    %c0_167 = arith.constant 0 : index
    %c13_168 = arith.constant 13 : index
    %c0_169 = arith.constant 0 : index
    %478 = vector.load %arg1[%c0_167, %c13_168, %c0_169] : memref<2x16x64xf32, #tpu.memory_space<vmem>>, vector<2x1x64xf32>
    %479 = vector.shape_cast %478 : vector<2x1x64xf32> to vector<2x64xf32>
    %480 = arith.maximumf %477, %479 : vector<2x64xf32>
    %481 = vector.extract_strided_slice %480 {offsets = [0, 0], sizes = [2, 4], strides = [1, 1]} : vector<2x64xf32> to vector<2x4xf32>
    %482 = vector.extract_strided_slice %480 {offsets = [0, 4], sizes = [2, 4], strides = [1, 1]} : vector<2x64xf32> to vector<2x4xf32>
    %483 = arith.maximumf %481, %482 : vector<2x4xf32>
    %484 = vector.extract_strided_slice %480 {offsets = [0, 8], sizes = [2, 4], strides = [1, 1]} : vector<2x64xf32> to vector<2x4xf32>
    %485 = vector.extract_strided_slice %480 {offsets = [0, 12], sizes = [2, 4], strides = [1, 1]} : vector<2x64xf32> to vector<2x4xf32>
    %486 = arith.maximumf %484, %485 : vector<2x4xf32>
    %487 = vector.extract_strided_slice %480 {offsets = [0, 16], sizes = [2, 4], strides = [1, 1]} : vector<2x64xf32> to vector<2x4xf32>
    %488 = arith.maximumf %486, %487 : vector<2x4xf32>
    %489 = vector.extract_strided_slice %480 {offsets = [0, 20], sizes = [2, 4], strides = [1, 1]} : vector<2x64xf32> to vector<2x4xf32>
    %490 = vector.extract_strided_slice %480 {offsets = [0, 24], sizes = [2, 4], strides = [1, 1]} : vector<2x64xf32> to vector<2x4xf32>
    %491 = arith.maximumf %489, %490 : vector<2x4xf32>
    %492 = vector.extract_strided_slice %480 {offsets = [0, 28], sizes = [2, 4], strides = [1, 1]} : vector<2x64xf32> to vector<2x4xf32>
    %493 = arith.maximumf %491, %492 : vector<2x4xf32>
    %494 = vector.extract_strided_slice %480 {offsets = [0, 32], sizes = [2, 4], strides = [1, 1]} : vector<2x64xf32> to vector<2x4xf32>
    %495 = vector.extract_strided_slice %480 {offsets = [0, 36], sizes = [2, 4], strides = [1, 1]} : vector<2x64xf32> to vector<2x4xf32>
    %496 = arith.maximumf %494, %495 : vector<2x4xf32>
    %497 = vector.extract_strided_slice %480 {offsets = [0, 40], sizes = [2, 4], strides = [1, 1]} : vector<2x64xf32> to vector<2x4xf32>
    %498 = arith.maximumf %496, %497 : vector<2x4xf32>
    %499 = vector.extract_strided_slice %480 {offsets = [0, 44], sizes = [2, 4], strides = [1, 1]} : vector<2x64xf32> to vector<2x4xf32>
    %500 = vector.extract_strided_slice %480 {offsets = [0, 48], sizes = [2, 4], strides = [1, 1]} : vector<2x64xf32> to vector<2x4xf32>
    %501 = arith.maximumf %499, %500 : vector<2x4xf32>
    %502 = vector.extract_strided_slice %480 {offsets = [0, 52], sizes = [2, 4], strides = [1, 1]} : vector<2x64xf32> to vector<2x4xf32>
    %503 = arith.maximumf %501, %502 : vector<2x4xf32>
    %504 = vector.extract_strided_slice %480 {offsets = [0, 56], sizes = [2, 4], strides = [1, 1]} : vector<2x64xf32> to vector<2x4xf32>
    %505 = vector.extract_strided_slice %480 {offsets = [0, 60], sizes = [2, 4], strides = [1, 1]} : vector<2x64xf32> to vector<2x4xf32>
    %506 = arith.maximumf %504, %505 : vector<2x4xf32>
    %c0_170 = arith.constant 0 : index
    %c14_171 = arith.constant 14 : index
    %c0_172 = arith.constant 0 : index
    %507 = vector.load %arg1[%c0_170, %c14_171, %c0_172] : memref<2x16x64xf32, #tpu.memory_space<vmem>>, vector<2x1x64xf32>
    %508 = vector.shape_cast %507 : vector<2x1x64xf32> to vector<2x64xf32>
    %c0_173 = arith.constant 0 : index
    %c15_174 = arith.constant 15 : index
    %c0_175 = arith.constant 0 : index
    %509 = vector.load %arg1[%c0_173, %c15_174, %c0_175] : memref<2x16x64xf32, #tpu.memory_space<vmem>>, vector<2x1x64xf32>
    %510 = vector.shape_cast %509 : vector<2x1x64xf32> to vector<2x64xf32>
    %511 = arith.maximumf %508, %510 : vector<2x64xf32>
    %512 = vector.extract_strided_slice %511 {offsets = [0, 0], sizes = [2, 4], strides = [1, 1]} : vector<2x64xf32> to vector<2x4xf32>
    %513 = vector.extract_strided_slice %511 {offsets = [0, 4], sizes = [2, 4], strides = [1, 1]} : vector<2x64xf32> to vector<2x4xf32>
    %514 = arith.maximumf %512, %513 : vector<2x4xf32>
    %515 = vector.extract_strided_slice %511 {offsets = [0, 8], sizes = [2, 4], strides = [1, 1]} : vector<2x64xf32> to vector<2x4xf32>
    %516 = vector.extract_strided_slice %511 {offsets = [0, 12], sizes = [2, 4], strides = [1, 1]} : vector<2x64xf32> to vector<2x4xf32>
    %517 = arith.maximumf %515, %516 : vector<2x4xf32>
    %518 = vector.extract_strided_slice %511 {offsets = [0, 16], sizes = [2, 4], strides = [1, 1]} : vector<2x64xf32> to vector<2x4xf32>
    %519 = arith.maximumf %517, %518 : vector<2x4xf32>
    %520 = vector.extract_strided_slice %511 {offsets = [0, 20], sizes = [2, 4], strides = [1, 1]} : vector<2x64xf32> to vector<2x4xf32>
    %521 = vector.extract_strided_slice %511 {offsets = [0, 24], sizes = [2, 4], strides = [1, 1]} : vector<2x64xf32> to vector<2x4xf32>
    %522 = arith.maximumf %520, %521 : vector<2x4xf32>
    %523 = vector.extract_strided_slice %511 {offsets = [0, 28], sizes = [2, 4], strides = [1, 1]} : vector<2x64xf32> to vector<2x4xf32>
    %524 = arith.maximumf %522, %523 : vector<2x4xf32>
    %525 = vector.extract_strided_slice %511 {offsets = [0, 32], sizes = [2, 4], strides = [1, 1]} : vector<2x64xf32> to vector<2x4xf32>
    %526 = vector.extract_strided_slice %511 {offsets = [0, 36], sizes = [2, 4], strides = [1, 1]} : vector<2x64xf32> to vector<2x4xf32>
    %527 = arith.maximumf %525, %526 : vector<2x4xf32>
    %528 = vector.extract_strided_slice %511 {offsets = [0, 40], sizes = [2, 4], strides = [1, 1]} : vector<2x64xf32> to vector<2x4xf32>
    %529 = arith.maximumf %527, %528 : vector<2x4xf32>
    %530 = vector.extract_strided_slice %511 {offsets = [0, 44], sizes = [2, 4], strides = [1, 1]} : vector<2x64xf32> to vector<2x4xf32>
    %531 = vector.extract_strided_slice %511 {offsets = [0, 48], sizes = [2, 4], strides = [1, 1]} : vector<2x64xf32> to vector<2x4xf32>
    %532 = arith.maximumf %530, %531 : vector<2x4xf32>
    %533 = vector.extract_strided_slice %511 {offsets = [0, 52], sizes = [2, 4], strides = [1, 1]} : vector<2x64xf32> to vector<2x4xf32>
    %534 = arith.maximumf %532, %533 : vector<2x4xf32>
    %535 = vector.extract_strided_slice %511 {offsets = [0, 56], sizes = [2, 4], strides = [1, 1]} : vector<2x64xf32> to vector<2x4xf32>
    %536 = vector.extract_strided_slice %511 {offsets = [0, 60], sizes = [2, 4], strides = [1, 1]} : vector<2x64xf32> to vector<2x4xf32>
    %537 = arith.maximumf %535, %536 : vector<2x4xf32>
    %cst = arith.constant 0.000000e+00 : f32
    %538 = vector.broadcast %cst : f32 to vector<2x28xf32>
    %539 = tpu.concatenate %77, %115, %130, %168, %183, %201, %208, %215, %222, %240, %247, %254, %261, %279, %286, %293 in 1 : vector<2x4xf32>, vector<2x4xf32>, vector<2x4xf32>, vector<2x4xf32>, vector<2x4xf32>, vector<2x4xf32>, vector<2x4xf32>, vector<2x4xf32>, vector<2x4xf32>, vector<2x4xf32>, vector<2x4xf32>, vector<2x4xf32>, vector<2x4xf32>, vector<2x4xf32>, vector<2x4xf32>, vector<2x4xf32> -> vector<2x64xf32>
    %540 = tpu.concatenate %300, %318, %325, %332, %339, %347, %352, %357, %362, %367, %370, %381, %386, %391, %396, %401 in 1 : vector<2x4xf32>, vector<2x4xf32>, vector<2x4xf32>, vector<2x4xf32>, vector<2x4xf32>, vector<2x4xf32>, vector<2x4xf32>, vector<2x4xf32>, vector<2x4xf32>, vector<2x4xf32>, vector<2x4xf32>, vector<2x4xf32>, vector<2x4xf32>, vector<2x4xf32>, vector<2x4xf32>, vector<2x4xf32> -> vector<2x64xf32>
    %541 = tpu.concatenate %404, %415, %420, %425, %430, %435, %438, %449, %454, %459, %464, %469, %472, %483, %488, %493 in 1 : vector<2x4xf32>, vector<2x4xf32>, vector<2x4xf32>, vector<2x4xf32>, vector<2x4xf32>, vector<2x4xf32>, vector<2x4xf32>, vector<2x4xf32>, vector<2x4xf32>, vector<2x4xf32>, vector<2x4xf32>, vector<2x4xf32>, vector<2x4xf32>, vector<2x4xf32>, vector<2x4xf32>, vector<2x4xf32> -> vector<2x64xf32>
    %542 = tpu.concatenate %498, %503, %506, %514, %519, %524, %529, %534, %537, %538 in 1 : vector<2x4xf32>, vector<2x4xf32>, vector<2x4xf32>, vector<2x4xf32>, vector<2x4xf32>, vector<2x4xf32>, vector<2x4xf32>, vector<2x4xf32>, vector<2x4xf32>, vector<2x28xf32> -> vector<2x64xf32>
    %543 = tpu.concatenate %539, %540, %541, %542 in 1 : vector<2x64xf32>, vector<2x64xf32>, vector<2x64xf32>, vector<2x64xf32> -> vector<2x256xf32>
    %c0_176 = arith.constant 0 : index
    %c0_177 = arith.constant 0 : index
    %544 = vector.load %arg2[%c0_176, %c0_177] : memref<2x256xf32, #tpu.memory_space<vmem>>, vector<2x256xf32>
    tpu.vector_store %arg2[%c0_176, %c0_177], %543 {strides = array<i32>} : memref<2x256xf32, #tpu.memory_space<vmem>>, vector<2x256xf32>,
    return
  }
  func.func @transform_0(%arg0: i32) -> (i32, i32, i32) {
    %c0_i32 = arith.constant 0 : i32
    %c0_i32_0 = arith.constant 0 : i32
    %c0_i32_1 = arith.constant 0 : i32
    return %arg0, %c0_i32, %c0_i32_0 : i32, i32, i32
  }
  func.func @transform_1(%arg0: i32) -> (i32, i32) {
    %c0_i32 = arith.constant 0 : i32
    %c0_i32_0 = arith.constant 0 : i32
    return %arg0, %c0_i32 : i32, i32
  }
}

</mosaic_0001>

<bundles_post_ra>
// kernel: tpu_custom_call.1
= control target key start
LH: loop header
LB: loop body
LE: loop exit
PB: predicated region body
PF: predicated region fallthrough
CT: control target
= control target key end

     0   :  { %6 = vsyncpa [#allocation3], 0  ;;  %s1799_s0 = inlined_call_operand.hbm [shape: f32[2,16,64], index: 0, kind: input, shape index: {}]   ;;  %s1800_s1 = inlined_call_operand.hbm [shape: f32[2,256], index: 1, kind: output, shape index: {}]  }
   0x1   :  { %7 = vsyncpa [#allocation4], 0  ;;  %s999_s6 = smov [#allocation2]   ;;  %s951_s10 = scalar_lea.hbm %s1799_s0, 512 }
   0x2   :  { %s13_s7 = sshll.u32 %s999_s6, 4  ;;  %p952_p0 = scmp.ne.s32.totalorder %s1799_s0, %s951_s10  ;;  %s14_s7 = int_to_ptr.vmem [resolvable:$true] %s13_s7 }
   0x3   :  { %p955_p1 = scmp.lt.u32.totalorder %s951_s10, %s1799_s0 }
   0x5   :  { %p957_p2 = pnand %p955_p1, %p952_p0 }
   0x7   :  { %960 = shalt.err (!%p957_p2)
}
   0x8   :  { %s961_s15 = scalar_lea.vmem %s14_s7, 512  ;;  %p966_p4 = scmp.lt.s32.totalorder %s14_s7, %s14_s7 }
   0x9   :  { %p962_p3 = scmp.ne.s32.totalorder %s14_s7, %s961_s15  ;;  %p967_p5 = scmp.lt.s32.totalorder %s961_s15, %s961_s15 }
   0xb   :  { %p968_p6 = por %p967_p5, %p966_p4 }
   0xd   :  { %p969_p7 = pnand %p968_p6, %p962_p3 }
   0xf   :  { %972 = shalt.err (!%p969_p7)
}
  0x10   :  { %s1000_s16 = smov 128   ;;  %s1001_s17 = smov 8  }
  0x11   :  { %19 = dma.hbm_to_vmem [thread:$0]  %s1799_s0, 512, %s14_s7, [#allocation3], %s1000_s16, %s1000_s16, %s1001_s17  }
  0x12   :  { %995 = dma.done.wait [#allocation3], 512  }
  0x13   :  { %996 = vsyncadd [#allocation3], 4294966784  ;;  %v23_v0 = vld [vmem:[#allocation2] sm:$0x1]  ;;  %v25_v1 = vld [vmem:[#allocation2 + $0x1] sm:$0x1] }
  0x14   :  { %v1054_v2 = vld [vmem:[#allocation2 + $0x2] sm:$0x1]  ;;  %v1056_v3 = vmax.f32 %v23_v0, %v25_v1  ;;  %v1058_v4 = vld [vmem:[#allocation2 + $0x3] sm:$0x1]  ;;  %v53_v6 = vld [vmem:[#allocation2 + $0x8] sm:$0x1] }
  0x15   :  { %v57_v7 = vld [vmem:[#allocation2 + $0x9] sm:$0x1]  ;;  %v1062_v8 = vld [vmem:[#allocation2 + $0x4] sm:$0x1]  ;;  %v61_v11 = vld [vmem:[#allocation2 + $0xa] sm:$0x1] }
  0x16   :  { %v31_v5 = vmax.f32 %v1056_v3, %v1054_v2  ;;  %v265_v9 = vmax.f32 %v53_v6, %v57_v7  ;;  %v24_v12 = vld [vmem:[#allocation2 + $0x10] sm:$0x1]  ;;  %v26_v13 = vld [vmem:[#allocation2 + $0x11] sm:$0x1]  ;;  %v1067_v14 = vld [vmem:[#allocation2 + $0x5] sm:$0x1] }
  0x17   :  { %v1069_v15 = vmax.f32 %v24_v12, %v26_v13  ;;  %v1071_v16 = vld [vmem:[#allocation2 + $0x12] sm:$0x1]  ;;  %v1077_v19 = vld [vmem:[#allocation2 + $0xb] sm:$0x1]  ;;  %v1079_v20 = vld [vmem:[#allocation2 + $0x13] sm:$0x1] }
  0x18   :  { %v1065_v10 = vmax.f32 %v31_v5, %v1058_v4  ;;  %v1073_v17 = vmax.f32 %v265_v9, %v61_v11  ;;  %v1081_v21 = vld [vmem:[#allocation2 + $0x6] sm:$0x1]  ;;  %v54_v23 = vld [vmem:[#allocation2 + $0x18] sm:$0x1]  ;;  %v58_v24 = vld [vmem:[#allocation2 + $0x19] sm:$0x1] }
  0x19   :  { %v32_v22 = vmax.f32 %v1069_v15, %v1071_v16  ;;  %v1090_v27 = vld [vmem:[#allocation2 + $0xc] sm:$0x1]  ;;  %v1092_v28 = vld [vmem:[#allocation2 + $0x14] sm:$0x1]  ;;  %v266_v29 = vmax.f32 %v54_v23, %v58_v24  ;;  %v1094_v30 = vld [vmem:[#allocation2 + $0x7] sm:$0x1] }
  0x1a   :  { %v39_v18 = vmax.f32 %v1065_v10, %v1062_v8  ;;  %v1087_v25 = vmax.f32 %v1073_v17, %v1077_v19  ;;  %v62_v32 = vld [vmem:[#allocation2 + $0x1a] sm:$0x1]  ;;  %v1102_v35 = vld [vmem:[#allocation2 + $0xd] sm:$0x1]  ;;  %v1104_v36 = vld [vmem:[#allocation2 + $0x15] sm:$0x1] }
  0x1b   :  { %v1097_v31 = vmax.f32 %v32_v22, %v1079_v20  ;;  %v1106_v37 = vmax.f32 %v266_v29, %v62_v32  ;;  %v1108_v38 = vld [vmem:[#allocation2 + $0xe] sm:$0x1]  ;;  %v66_v40 = vld [vmem:[#allocation2 + $0x1b] sm:$0x1]  ;;  %v1116_v43 = vld [vmem:[#allocation2 + $0x16] sm:$0x1]  ;;  %v421_v12 = vmax.f32 %v1090_v27, %v1102_v35 }
  0x1c   :  { %v43_v26 = vmax.f32 %v39_v18, %v1067_v14  ;;  %v271_v33 = vmax.f32 %v1087_v25, %v1090_v27  ;;  %v70_v44 = vld [vmem:[#allocation2 + $0x1c] sm:$0x1]  ;;  %v74_v45 = vld [vmem:[#allocation2 + $0x1d] sm:$0x1]  ;;  %v1124_v51 = vld [vmem:[#allocation2 + $0xf] sm:$0x1] }
  0x1d   :  { %1806 = vst [vmem:[#allocation8_spill] sm:$0xff] %v1097_v31  ;;  %v40_v39 = vmax.f32 %v1097_v31, %v1092_v28  ;;  %v1119_v46 = vmax.f32 %v1106_v37, %v66_v40  ;;  %v422_v49 = vmax.f32 %v70_v44, %v74_v45  ;;  %v1126_v52 = vld [vmem:[#allocation2 + $0x17] sm:$0x1]  ;;  %v78_v53 = vld [vmem:[#allocation2 + $0x1e] sm:$0x1]  ;;  %v423_v18 = vmax.f32 %v421_v12, %v1108_v38  ;;  %s1002_s0 = smov 120  }
  0x1e   :  { %v47_v34 = vmax.f32 %v43_v26, %v1081_v21  ;;  %v273_v41 = vmax.f32 %v271_v33, %v1102_v35  ;;  %v82_v59 = vld [vmem:[#allocation2 + $0x1f] sm:$0x1]  ;;  %s1003_s20 = smov 124   ;;  %s1004_s21 = smov 116   ;;  %vm578_vm0 = vcmask 1041409   ;;  %vm644_vm1 = vcmask 31744  }
  0x1f   :  { %v44_v47 = vmax.f32 %v40_v39, %v1104_v36  ;;  %v272_v54 = vmax.f32 %v1119_v46, %v70_v44  ;;  %v424_v57 = vmax.f32 %v422_v49, %v78_v53  ;;  %s1005_s22 = smov 112   ;;  %s1006_s23 = smov 108   ;;  %v534_v39 = vmax.f32 %v66_v40, %v70_v44 }
  0x20   :  { %v1114_v42 = vmax.f32 %v47_v34, %v1094_v30  ;;  %v275_v48 = vmax.f32 %v273_v41, %v1108_v38  ;;  %s1007_s24 = smov 104   ;;  %s1008_s25 = smov 100   ;;  %vm646_vm2 = vcmask 64512   ;;  %vm648_vm3 = vcmask 97280  }
  0x21   :  { %v48_v55 = vmax.f32 %v44_v47, %v1116_v43  ;;  %v274_v60 = vmax.f32 %v272_v54, %v74_v45  ;;  %v1136_v62 = vmax.f32 %v424_v57, %v82_v59  ;;  %v1176_v41 = vmax.f32 %v534_v39, %v74_v45  ;;  %s1009_s26 = smov 96   ;;  %s1010_s27 = smov 92  }
  0x22   :  { %v55_v50 = vmax.f32 %v1114_v42, %v53_v6  ;;  %v1131_v56 = vmax.f32 %v275_v48, %v1124_v51  ;;  %v533_v47 = vmax.f32 %v1077_v19, %v1090_v27  ;;  %s1011_s28 = smov 88   ;;  %s1012_s29 = smov 84   ;;  %vm650_vm4 = vcmask 130048  }
  0x23   :  { %v1134_v61 = vmax.f32 %v48_v55, %v1126_v52  ;;  %v276_v0 = vmax.f32 %v274_v60, %v78_v53  ;;  %s1013_s30 = smov 80   ;;  %s1014_s2 = smov 76   ;;  %vm652_vm5 = vcmask 162816   ;;  %vm654_vm6 = vcmask 195584  }
  0x24   :  { %v59_v58 = vmax.f32 %v55_v50, %v57_v7  ;;  %v1185_v48 = vmax.f32 %v533_v47, %v1102_v35  ;;  %s1015_s3 = smov 72   ;;  %s1016_s4 = smov 68   ;;  %vm656_vm7 = vcmask 228352   ;;  %vm658_vm8 = vcmask 261120  }
  0x25   :  { %v56_v1 = vmax.f32 %v1134_v61, %v54_v23  ;;  %v1140_v6 = vmax.f32 %v276_v0, %v82_v59  ;;  %s1017_s5 = smov 4   ;;  %s1018_s6 = smov 20   ;;  %vm660_vm9 = vcmask 293888   ;;  %vm662_vm10 = vcmask 326656  }
  0x26   :  { %v63_v63 = vmax.f32 %v59_v58, %v61_v11  ;;  %v1148_v11 = vmax.f32 %v423_v18, %v1124_v51  ;;  %s1019_s7 = smov 16   ;;  %s1020_s8 = smov 12   ;;  %vm664_vm11 = vcmask 359424   ;;  %vm666_vm12 = vcmask 392192  }
  0x27   :  { %v60_v9 = vmax.f32 %v56_v1, %v58_v24  ;;  %s1021_s9 = smov 44   ;;  %s1022_s10 = smov 40   ;;  %vm668_vm13 = vcmask 424960   ;;  %vm670_vm14 = vcmask 457728   ;;  %vm672_vm15 = vcmask 490496  }
  0x28   :  { %v67_v5 = vmax.f32 %v63_v63, %v1077_v19  ;;  %v472_v19 = vmax.f32 %v1071_v16, %v1079_v20  ;;  %s1023_s11 = smov 32   ;;  %s1024_s12 = smov 24  }
  0x29   :  { %v64_v13 = vmax.f32 %v60_v9, %v62_v32  ;;  %s1025_s13 = smov 28   ;;  %s1026_s14 = smov 36  }
  0x2a   :  { %v71_v7 = vmax.f32 %v67_v5, %v1090_v27  ;;  %v1203_v27 = vmax.f32 %v1108_v38, %v1124_v51  ;;  %s1027_s15 = smov 52   ;;  %s1028_s16 = smov 48  }
  0x2b   :  { %v68_v26 = vmax.f32 %v64_v13, %v66_v40  ;;  %v1195_v40 = vmax.f32 %v78_v53, %v82_v59  ;;  %s1030_s18 = smov [#allocation5]  }
  0x2c   :  { %v75_v22 = vmax.f32 %v71_v7, %v1102_v35  ;;  %v1363_v7 = vmax.f32 %v472_v19, %v1092_v28  ;;  %v493_v19 = vmax.f32 %v1067_v14, %v1081_v21  ;;  %s909_s19 = sshll.u32 %s1030_s18, 4  ;;  %s910_s19 = int_to_ptr.vmem [resolvable:$true] %s909_s19 }
  0x2d   :  { %v72_v29 = vmax.f32 %v68_v26, %v70_v44  ;;  %p978_p9 = scmp.lt.s32.totalorder %s910_s19, %s910_s19 }
  0x2e   :  { %v79_v23 = vmax.f32 %v75_v22, %v1108_v38  ;;  %v471_v22 = vmax.f32 %v1054_v2, %v1058_v4 }
  0x2f   :  { %v76_v24 = vmax.f32 %v72_v29, %v74_v45 }
  0x30   :  { %v1152_v33 = vmax.f32 %v79_v23, %v1124_v51  ;;  %v1384_v16 = vmax.f32 %v471_v22, %v1062_v8 }
  0x31   :  { %v80_v32 = vmax.f32 %v76_v24, %v78_v53  ;;  %v494_v24 = vmax.f32 %v1104_v36, %v1116_v43 }
  0x32   :  { %1807 = vst [vmem:[#allocation9_spill] sm:$0xff] %v1152_v33  ;;  %95 = vrot.lane.b32.xlu1 %v1152_v33, %s1002_s0  ;;  %87 = vrot.lane.b32.xlu0 %v1152_v33, %s1003_s20 }
  0x33   :  { %v1158_v34 = vmax.f32 %v80_v32, %v82_v59  ;;  %v1413_v47 = vmax.f32 %v494_v24, %v1126_v52  ;;  %v364_v24 = vmax.f32 %v1092_v28, %v1104_v36 }
  0x35   :  { %1808 = vst [vmem:[#allocation10_spill] sm:$0xff] %v1158_v34  ;;  %1839 = vst [vmem:[#allocation41_spill] sm:$0xff] %v1413_v47 }
  0x36   :  { %97 = vrot.lane.b32.xlu1 %v1158_v34, %s1002_s0  ;;  %89 = vrot.lane.b32.xlu0 %v1158_v34, %s1003_s20 }
  0x3a   :  { %105 = vrot.lane.b32.xlu1 %v1158_v34, %s1004_s21  ;;  %103 = vrot.lane.b32.xlu0 %v1152_v33, %s1004_s21 }
  0x3e   :  { %113 = vrot.lane.b32.xlu1 %v1158_v34, %s1005_s22  ;;  %111 = vrot.lane.b32.xlu0 %v1152_v33, %s1005_s22 }
  0x42   :  { %121 = vrot.lane.b32.xlu1 %v1158_v34, %s1006_s23  ;;  %119 = vrot.lane.b32.xlu0 %v1152_v33, %s1006_s23 }
  0x46   :  { %129 = vrot.lane.b32.xlu1 %v1158_v34, %s1007_s24  ;;  %127 = vrot.lane.b32.xlu0 %v1152_v33, %s1007_s24 }
  0x4a   :  { %137 = vrot.lane.b32.xlu1 %v1158_v34, %s1008_s25  ;;  %135 = vrot.lane.b32.xlu0 %v1152_v33, %s1008_s25 }
  0x4e   :  { %145 = vrot.lane.b32.xlu1 %v1158_v34, %s1009_s26  ;;  %143 = vrot.lane.b32.xlu0 %v1152_v33, %s1009_s26 }
  0x52   :  { %153 = vrot.lane.b32.xlu1 %v1158_v34, %s1010_s27  ;;  %151 = vrot.lane.b32.xlu0 %v1152_v33, %s1010_s27 }
  0x56   :  { %161 = vrot.lane.b32.xlu1 %v1158_v34, %s1011_s28  ;;  %159 = vrot.lane.b32.xlu0 %v1152_v33, %s1011_s28 }
  0x5a   :  { %169 = vrot.lane.b32.xlu1 %v1158_v34, %s1012_s29  ;;  %167 = vrot.lane.b32.xlu0 %v1152_v33, %s1012_s29 }
  0x5e   :  { %177 = vrot.lane.b32.xlu1 %v1158_v34, %s1013_s30  ;;  %175 = vrot.lane.b32.xlu0 %v1152_v33, %s1013_s30 }
  0x62   :  { %185 = vrot.lane.b32.xlu1 %v1158_v34, %s1014_s2  ;;  %183 = vrot.lane.b32.xlu0 %v1152_v33, %s1014_s2 }
  0x66   :  { %193 = vrot.lane.b32.xlu1 %v1158_v34, %s1015_s3  ;;  %191 = vrot.lane.b32.xlu0 %v1152_v33, %s1015_s3 }
  0x6a   :  { %201 = vrot.lane.b32.xlu1 %v1158_v34, %s1016_s4  ;;  %199 = vrot.lane.b32.xlu0 %v1152_v33, %s1016_s4 }
  0x6e   :  { %211 = vrot.lane.b32.xlu1 %v1134_v61, %s1003_s20  ;;  %209 = vrot.lane.b32.xlu0 %v1114_v42, %s1003_s20 }
  0x72   :  { %219 = vrot.lane.b32.xlu1 %v1134_v61, %s1002_s0  ;;  %217 = vrot.lane.b32.xlu0 %v1114_v42, %s1002_s0 }
  0x76   :  { %227 = vrot.lane.b32.xlu1 %v1134_v61, %s1004_s21  ;;  %225 = vrot.lane.b32.xlu0 %v1114_v42, %s1004_s21 }
  0x7a   :  { %235 = vrot.lane.b32.xlu1 %v1134_v61, %s1005_s22  ;;  %233 = vrot.lane.b32.xlu0 %v1114_v42, %s1005_s22 }
  0x7e   :  { %243 = vrot.lane.b32.xlu1 %v1134_v61, %s1006_s23  ;;  %241 = vrot.lane.b32.xlu0 %v1114_v42, %s1006_s23 }
  0x82   :  { %251 = vrot.lane.b32.xlu1 %v1134_v61, %s1007_s24  ;;  %249 = vrot.lane.b32.xlu0 %v1114_v42, %s1007_s24 }
  0x86   :  { %259 = vrot.lane.b32.xlu1 %v1134_v61, %s1008_s25  ;;  %257 = vrot.lane.b32.xlu0 %v1114_v42, %s1008_s25 }
  0x8a   :  { %283 = vrot.lane.b32.xlu1 %v1140_v6, %s1003_s20  ;;  %281 = vrot.lane.b32.xlu0 %v1131_v56, %s1003_s20 }
  0x8e   :  { %291 = vrot.lane.b32.xlu1 %v1140_v6, %s1002_s0  ;;  %289 = vrot.lane.b32.xlu0 %v1131_v56, %s1002_s0 }
  0x92   :  { %299 = vrot.lane.b32.xlu1 %v1140_v6, %s1004_s21  ;;  %297 = vrot.lane.b32.xlu0 %v1131_v56, %s1004_s21 }
  0x96   :  { %307 = vrot.lane.b32.xlu1 %v1140_v6, %s1005_s22  ;;  %305 = vrot.lane.b32.xlu0 %v1131_v56, %s1005_s22 }
  0x9a   :  { %315 = vrot.lane.b32.xlu1 %v1140_v6, %s1006_s23  ;;  %313 = vrot.lane.b32.xlu0 %v1131_v56, %s1006_s23 }
  0x9e   :  { %323 = vrot.lane.b32.xlu1 %v1140_v6, %s1007_s24  ;;  %321 = vrot.lane.b32.xlu0 %v1131_v56, %s1007_s24 }
  0xa2   :  { %331 = vrot.lane.b32.xlu1 %v1140_v6, %s1008_s25  ;;  %329 = vrot.lane.b32.xlu0 %v1131_v56, %s1008_s25 }
  0xa4   :  { %v1279_v35 = vpop.permute.xlu1 %95  ;;  %v1281_v38 = vpop.permute.xlu0 %87 }
  0xa5   :  { %1809 = vst [vmem:[#allocation11_spill] sm:$0xff] %v1279_v35  ;;  %1810 = vst [vmem:[#allocation12_spill] sm:$0xff] %v1281_v38 }
  0xa6   :  { %431 = vrot.lane.b32.xlu1 %v1136_v62, %s1003_s20  ;;  %399 = vrot.lane.b32.xlu0 %v1119_v46, %s1003_s20 }
  0xa8   :  { %v1287_v44 = vpop.permute.xlu1 %97  ;;  %v1289_v45 = vpop.permute.xlu0 %89 }
  0xa9   :  { %1811 = vst [vmem:[#allocation13_spill] sm:$0xff] %v1287_v44  ;;  %1812 = vst [vmem:[#allocation14_spill] sm:$0xff] %v1289_v45 }
  0xaa   :  { %407 = vrot.lane.b32.xlu1 %v1119_v46, %s1002_s0  ;;  %397 = vrot.lane.b32.xlu0 %v1087_v25, %s1003_s20 }
  0xac   :  { %v1295_v49 = vpop.permute.xlu1 %105  ;;  %v1297_v50 = vpop.permute.xlu0 %103 }
  0xad   :  { %1813 = vst [vmem:[#allocation15_spill] sm:$0xff] %v1295_v49  ;;  %1814 = vst [vmem:[#allocation16_spill] sm:$0xff] %v1297_v50 }
  0xae   :  { %439 = vrot.lane.b32.xlu1 %v1136_v62, %s1002_s0  ;;  %429 = vrot.lane.b32.xlu0 %v1148_v11, %s1003_s20 }
  0xb0   :  { %v1303_v51 = vpop.permute.xlu1 %113  ;;  %v1305_v53 = vpop.permute.xlu0 %111 }
  0xb1   :  { %1815 = vst [vmem:[#allocation17_spill] sm:$0xff] %v1303_v51  ;;  %1816 = vst [vmem:[#allocation18_spill] sm:$0xff] %v1305_v53 }
  0xb2   :  { %415 = vrot.lane.b32.xlu1 %v1119_v46, %s1004_s21  ;;  %405 = vrot.lane.b32.xlu0 %v1087_v25, %s1002_s0 }
  0xb4   :  { %v1311_v54 = vpop.permute.xlu1 %121  ;;  %v1313_v55 = vpop.permute.xlu0 %119 }
  0xb5   :  { %1817 = vst [vmem:[#allocation19_spill] sm:$0xff] %v1311_v54  ;;  %1818 = vst [vmem:[#allocation20_spill] sm:$0xff] %v1313_v55 }
  0xb6   :  { %447 = vrot.lane.b32.xlu1 %v1136_v62, %s1004_s21  ;;  %437 = vrot.lane.b32.xlu0 %v1148_v11, %s1002_s0 }
  0xb8   :  { %v1319_v57 = vpop.permute.xlu1 %129  ;;  %v1321_v58 = vpop.permute.xlu0 %127 }
  0xb9   :  { %1819 = vst [vmem:[#allocation21_spill] sm:$0xff] %v1319_v57  ;;  %1820 = vst [vmem:[#allocation22_spill] sm:$0xff] %v1321_v58 }
  0xba   :  { %445 = vrot.lane.b32.xlu1 %v1148_v11, %s1004_s21  ;;  %413 = vrot.lane.b32.xlu0 %v1087_v25, %s1004_s21 }
  0xbc   :  { %v1327_v59 = vpop.permute.xlu1 %137  ;;  %v1329_v60 = vpop.permute.xlu0 %135 }
  0xbd   :  { %1821 = vst [vmem:[#allocation23_spill] sm:$0xff] %v1327_v59  ;;  %1822 = vst [vmem:[#allocation24_spill] sm:$0xff] %v1329_v60 }
  0xbe   :  { %457 = vrot.lane.b32.xlu0 %v1069_v15, %s1003_s20  ;;  %541 = vrot.lane.b32.xlu1 %v1176_v41, %s1003_s20 }
  0xc0   :  { %v1335_v63 = vpop.permute.xlu1 %145  ;;  %v1337_v0 = vpop.permute.xlu0 %143 }
  0xc1   :  { %1823 = vst [vmem:[#allocation25_spill] sm:$0xff] %v1335_v63  ;;  %1824 = vst [vmem:[#allocation26_spill] sm:$0xff] %v1337_v0 }
  0xc2   :  { %455 = vrot.lane.b32.xlu0 %v1056_v3, %s1003_s20  ;;  %465 = vrot.lane.b32.xlu1 %v1069_v15, %s1002_s0 }
  0xc4   :  { %v1343_v1 = vpop.permute.xlu1 %153  ;;  %v1345_v5 = vpop.permute.xlu0 %151 }
  0xc5   :  { %1825 = vst [vmem:[#allocation27_spill] sm:$0xff] %v1343_v1  ;;  %1826 = vst [vmem:[#allocation28_spill] sm:$0xff] %v1345_v5 }
  0xc6   :  { %539 = vrot.lane.b32.xlu0 %v1185_v48, %s1003_s20  ;;  %549 = vrot.lane.b32.xlu1 %v1176_v41, %s1002_s0 }
  0xc8   :  { %v1351_v9 = vpop.permute.xlu1 %161  ;;  %v1353_v12 = vpop.permute.xlu0 %159 }
  0xc9   :  { %1827 = vst [vmem:[#allocation29_spill] sm:$0xff] %v1351_v9  ;;  %1828 = vst [vmem:[#allocation30_spill] sm:$0xff] %v1353_v12 }
  0xca   :  { %463 = vrot.lane.b32.xlu0 %v1056_v3, %s1002_s0  ;;  %561 = vrot.lane.b32.xlu1 %v1195_v40, %s1003_s20 }
  0xcc   :  { %v1365_v13 = vpop.permute.xlu1 %169  ;;  %v1367_v18 = vpop.permute.xlu0 %167 }
  0xcd   :  { %1829 = vst [vmem:[#allocation31_spill] sm:$0xff] %v1365_v13  ;;  %1830 = vst [vmem:[#allocation32_spill] sm:$0xff] %v1367_v18 }
  0xce   :  { %547 = vrot.lane.b32.xlu0 %v1185_v48, %s1002_s0  ;;  %479 = vrot.lane.b32.xlu1 %v1363_v7, %s1003_s20 }
  0xd0   :  { %v1375_v26 = vpop.permute.xlu1 %177  ;;  %v1377_v23 = vpop.permute.xlu0 %175 }
  0xd1   :  { %1831 = vst [vmem:[#allocation33_spill] sm:$0xff] %v1375_v26  ;;  %1832 = vst [vmem:[#allocation34_spill] sm:$0xff] %v1377_v23  ;;  %v366_v23 = vmax.f32 %v364_v24, %v1116_v43 }
  0xd2   :  { %559 = vrot.lane.b32.xlu0 %v1203_v27, %s1003_s20  ;;  %569 = vrot.lane.b32.xlu1 %v1195_v40, %s1002_s0 }
  0xd3   :  { %v1448_v28 = vmax.f32 %v366_v23, %v1126_v52 }
  0xd4   :  { %v1386_v20 = vpop.permute.xlu1 %185  ;;  %v1388_v29 = vpop.permute.xlu0 %183 }
  0xd5   :  { %1833 = vst [vmem:[#allocation35_spill] sm:$0xff] %v1386_v20  ;;  %1834 = vst [vmem:[#allocation36_spill] sm:$0xff] %v1388_v29 }
  0xd6   :  { %477 = vrot.lane.b32.xlu0 %v1384_v16, %s1003_s20  ;;  %487 = vrot.lane.b32.xlu1 %v1363_v7, %s1002_s0 }
  0xd8   :  { %v1394_v2 = vpop.permute.xlu1 %193  ;;  %v1396_v4 = vpop.permute.xlu0 %191 }
  0xd9   :  { %1835 = vst [vmem:[#allocation37_spill] sm:$0xff] %v1394_v2  ;;  %1836 = vst [vmem:[#allocation38_spill] sm:$0xff] %v1396_v4 }
  0xda   :  { %567 = vrot.lane.b32.xlu0 %v1203_v27, %s1002_s0  ;;  %485 = vrot.lane.b32.xlu1 %v1384_v16, %s1002_s0 }
  0xdc   :  { %v1404_v32 = vpop.permute.xlu1 %201  ;;  %v1406_v39 = vpop.permute.xlu0 %199 }
  0xdd   :  { %1837 = vst [vmem:[#allocation39_spill] sm:$0xff] %v1404_v32  ;;  %1838 = vst [vmem:[#allocation40_spill] sm:$0xff] %v1406_v39  ;;  %v1426_v39 = vmax.f32 %v493_v19, %v1094_v30 }
  0xde   :  { %341 = vrot.lane.b32.xlu1 %v1097_v31, %s1003_s20  ;;  %339 = vrot.lane.b32.xlu0 %v1065_v10, %s1003_s20 }
  0xdf   :  { %1840 = vst [vmem:[#allocation42_spill] sm:$0xff] %v1426_v39 }
  0xe0   :  { %v1417_v22 = vpop.permute.xlu1 %211  ;;  %v1419_v4 = vpop.permute.xlu0 %209 }
  0xe2   :  { %501 = vrot.lane.b32.xlu1 %v1413_v47, %s1003_s20  ;;  %347 = vrot.lane.b32.xlu0 %v1065_v10, %s1002_s0 }
  0xe4   :  { %v1430_v29 = vpop.permute.xlu1 %219  ;;  %v1432_v32 = vpop.permute.xlu0 %217 }
  0xe6   :  { %499 = vrot.lane.b32.xlu1 %v1426_v39, %s1003_s20  ;;  %349 = vrot.lane.b32.xlu0 %v1097_v31, %s1002_s0 }
  0xe8   :  { %v1439_v2 = vpop.permute.xlu1 %227  ;;  %v1441_v18 = vpop.permute.xlu0 %225 }
  0xea   :  { %357 = vrot.lane.b32.xlu1 %v1097_v31, %s1004_s21  ;;  %509 = vrot.lane.b32.xlu0 %v1413_v47, %s1002_s0 }
  0xec   :  { %v1450_v36 = vpop.permute.xlu1 %235  ;;  %v1452_v19 = vpop.permute.xlu0 %233 }
  0xee   :  { %507 = vrot.lane.b32.xlu1 %v1426_v39, %s1002_s0  ;;  %373 = vrot.lane.b32.xlu0 %v1448_v28, %s1003_s20 }
  0xf0   :  { %v1458_v43 = vpop.permute.xlu1 %243  ;;  %v1460_v24 = vpop.permute.xlu0 %241 }
  0xf2   :  { %519 = vrot.lane.b32.xlu0 %v1106_v37, %s1003_s20 }
  0xf4   :  { %v1464_v20 = vpop.permute.xlu1 %251  ;;  %v1466_v52 = vpop.permute.xlu0 %249 }
  0xf5   :  { %1841 = vst [vmem:[#allocation43_spill] sm:$0xff] %v1466_v52 }
  0xf8   :  { %v1468_v23 = vpop.permute.xlu1 %259  ;;  %v1470_v12 = vpop.permute.xlu0 %257 }
  0xf9   :  { %1842 = vst [vmem:[#allocation44_spill] sm:$0xff] %v1470_v12 }
  0xfc   :  { %v1472_v26 = vpop.permute.xlu1 %283  ;;  %v1474_v5 = vpop.permute.xlu0 %281 }
 0x100   :  { %v1476_v13 = vpop.permute.xlu1 %291  ;;  %v1478_v0 = vpop.permute.xlu0 %289 }
 0x101   :  { %1843 = vst [vmem:[#allocation45_spill] sm:$0xff] %v1478_v0 }
 0x104   :  { %v1480_v9 = vpop.permute.xlu1 %299  ;;  %v1482_v60 = vpop.permute.xlu0 %297 }
 0x105   :  { %1844 = vst [vmem:[#allocation46_spill] sm:$0xff] %v1482_v60 }
 0x108   :  { %v1484_v1 = vpop.permute.xlu1 %307  ;;  %v1486_v58 = vpop.permute.xlu0 %305 }
 0x109   :  { %1845 = vst [vmem:[#allocation47_spill] sm:$0xff] %v1486_v58 }
 0x10c   :  { %v1488_v63 = vpop.permute.xlu1 %315  ;;  %v1490_v55 = vpop.permute.xlu0 %313 }
 0x10d   :  { %1846 = vst [vmem:[#allocation48_spill] sm:$0xff] %v1488_v63  ;;  %1847 = vst [vmem:[#allocation49_spill] sm:$0xff] %v1490_v55 }
 0x110   :  { %v1492_v59 = vpop.permute.xlu1 %323  ;;  %v1494_v53 = vpop.permute.xlu0 %321 }
 0x111   :  { %1848 = vst [vmem:[#allocation50_spill] sm:$0xff] %v1492_v59  ;;  %1849 = vst [vmem:[#allocation51_spill] sm:$0xff] %v1494_v53 }
 0x114   :  { %v1496_v57 = vpop.permute.xlu1 %331  ;;  %v1498_v50 = vpop.permute.xlu0 %329 }
 0x115   :  { %1850 = vst [vmem:[#allocation52_spill] sm:$0xff] %v1496_v57  ;;  %1851 = vst [vmem:[#allocation53_spill] sm:$0xff] %v1498_v50  ;;  %v363_v57 = vmax.f32 %v1062_v8, %v1067_v14 }
 0x118   :  { %v432_v54 = vpop.permute.xlu1 %431  ;;  %v400_v35 = vpop.permute.xlu0 %399 }
 0x119   :  { %v436_v45 = vmax.f32 %v1136_v62, %v432_v54  ;;  %v404_v31 = vmax.f32 %v1119_v46, %v400_v35  ;;  %v365_v62 = vmax.f32 %v363_v57, %v1081_v21 }
 0x11b   :  { %v1515_v14 = vmax.f32 %v365_v62, %v1094_v30 }
 0x11c   :  { %v408_v51 = vpop.permute.xlu1 %407  ;;  %v398_v49 = vpop.permute.xlu0 %397 }
 0x11d   :  { %v412_v55 = vmax.f32 %v404_v31, %v408_v51  ;;  %v403_v50 = vmax.f32 %v1087_v25, %v398_v49 }
 0x120   :  { %v440_v33 = vpop.permute.xlu1 %439  ;;  %v430_v38 = vpop.permute.xlu0 %429 }
 0x121   :  { %v444_v58 = vmax.f32 %v436_v45, %v440_v33  ;;  %v435_v59 = vmax.f32 %v1148_v11, %v430_v38 }
 0x124   :  { %v416_v44 = vpop.permute.xlu1 %415  ;;  %v406_v34 = vpop.permute.xlu0 %405 }
 0x125   :  { %v420_v60 = vmax.f32 %v412_v55, %v416_v44  ;;  %v411_v63 = vmax.f32 %v403_v50, %v406_v34 }
 0x127   :  { %v633_v46 = vrot.slane %v420_v60, 7 }
 0x128   :  { %v448_v39 = vpop.permute.xlu1 %447  ;;  %v438_v53 = vpop.permute.xlu0 %437 }
 0x129   :  { %v452_v12 = vmax.f32 %v444_v58, %v448_v39  ;;  %v443_v0 = vmax.f32 %v435_v59, %v438_v53 }
 0x12b   :  { %v679_v31 = vrot.slane %v452_v12, 7 }
 0x12c   :  { %v446_v52 = vpop.permute.xlu1 %445  ;;  %v414_v47 = vpop.permute.xlu0 %413 }
 0x12d   :  { %v451_v33 = vmax.f32 %v443_v0, %v446_v52  ;;  %v419_v35 = vmax.f32 %v411_v63, %v414_v47 }
 0x12f   :  { %v680_v45 = vsel %vm578_vm0, %v679_v31, %v451_v33  ;;  %v1509_v8 = vsel %vm578_vm0, %v633_v46, %v419_v35 }
 0x130   :  { %681 = vrot.lane.b32.xlu0 %v680_v45, %s1017_s5  ;;  %674 = vrot.lane.b32.xlu1 %v1509_v8, %s1013_s30  ;;  %v458_v21 = vpop.permute.xlu0 %457  ;;  %v542_v25 = vpop.permute.xlu1 %541 }
 0x131   :  { %v462_v50 = vmax.f32 %v1069_v15, %v458_v21  ;;  %v546_v57 = vmax.f32 %v1176_v41, %v542_v25 }
 0x133   :  { %v695_v55 = vrot.slane %v462_v50, 7  ;;  %v808_v46 = vrot.slane %v546_v57, 7 }
 0x134   :  { %371 = vrot.lane.b32.xlu0 %v1515_v14, %s1003_s20  ;;  %355 = vrot.lane.b32.xlu1 %v1065_v10, %s1004_s21  ;;  %v456_v11 = vpop.permute.xlu0 %455  ;;  %v466_v34 = vpop.permute.xlu1 %465 }
 0x135   :  { %v470_v53 = vmax.f32 %v462_v50, %v466_v34  ;;  %v461_v58 = vmax.f32 %v1056_v3, %v456_v11  ;;  %v216_v50 = vmax.f32 %v1134_v61, %v1417_v22 }
 0x137   :  { %v702_v59 = vrot.slane %v470_v53, 7  ;;  %v696_v12 = vsel %vm578_vm0, %v695_v55, %v461_v58 }
 0x138   :  { %684 = vrot.lane.b32.xlu0 %v680_v45, %s1002_s0  ;;  %381 = vrot.lane.b32.xlu1 %v1448_v28, %s1002_s0  ;;  %v540_v38 = vpop.permute.xlu0 %539  ;;  %v550_v44 = vpop.permute.xlu1 %549 }
 0x139   :  { %v545_v60 = vmax.f32 %v1185_v48, %v540_v38  ;;  %v554_v63 = vmax.f32 %v546_v57, %v550_v44  ;;  %v224_v57 = vmax.f32 %v216_v50, %v1430_v29  ;;  %v288_v29 = vmax.f32 %v1140_v6, %v1472_v26 }
 0x13b   :  { %v815_v41 = vrot.slane %v554_v63, 7 }
 0x13c   :  { %527 = vrot.lane.b32.xlu0 %v1106_v37, %s1002_s0  ;;  %517 = vrot.lane.b32.xlu1 %v1073_v17, %s1003_s20  ;;  %v464_v30 = vpop.permute.xlu0 %463  ;;  %v562_v49 = vpop.permute.xlu1 %561 }
 0x13d   :  { %v469_v0 = vmax.f32 %v461_v58, %v464_v30  ;;  %v566_v52 = vmax.f32 %v1195_v40, %v562_v49  ;;  %v1560_v40 = vsel %vm578_vm0, %v808_v46, %v545_v60  ;;  %v1857_v46 = vld [vmem:[#allocation46_spill] sm:$0xff] }
 0x13f   :  { %v1543_v47 = vsel %vm578_vm0, %v702_v59, %v469_v0  ;;  %v232_v59 = vmax.f32 %v224_v57, %v1439_v2 }
 0x140   :  { %379 = vrot.lane.b32.xlu0 %v1515_v14, %s1002_s0  ;;  %687 = vrot.lane.b32.xlu1 %v680_v45, %s1006_s23  ;;  %v480_v51 = vpop.permute.xlu1 %479  ;;  %v548_v54 = vpop.permute.xlu0 %547 }
 0x141   :  { %v553_v39 = vmax.f32 %v545_v60, %v548_v54  ;;  %v484_v21 = vmax.f32 %v1363_v7, %v480_v51  ;;  %v240_v60 = vmax.f32 %v232_v59, %v1450_v36  ;;  %v296_v36 = vmax.f32 %v288_v29, %v1476_v13  ;;  %v1863_v59 = vld [vmem:[#allocation51_spill] sm:$0xff] }
 0x143   :  { %v1551_v31 = vsel %vm578_vm0, %v815_v41, %v553_v39  ;;  %v719_v51 = vrot.slane %v484_v21, 7  ;;  %v248_v0 = vmax.f32 %v240_v60, %v1458_v43  ;;  %v304_v26 = vmax.f32 %v296_v36, %v1480_v9  ;;  %v1852_v43 = vld [vmem:[#allocation41_spill] sm:$0xff]  ;;  %v1853_v41 = vld [vmem:[#allocation43_spill] sm:$0xff] }
 0x144   :  { %690 = vrot.lane.b32.xlu0 %v680_v45, %s1009_s26  ;;  %389 = vrot.lane.b32.xlu1 %v1448_v28, %s1004_s21  ;;  %v570_v15 = vpop.permute.xlu1 %569  ;;  %v560_v3 = vpop.permute.xlu0 %559  ;;  %v849_v45 = vrot.slane %v566_v52, 7  ;;  %v1854_v39 = vld [vmem:[#allocation45_spill] sm:$0xff] }
 0x145   :  { %v574_v33 = vmax.f32 %v566_v52, %v570_v15  ;;  %v565_v25 = vmax.f32 %v1203_v27, %v560_v3  ;;  %v215_v15 = vmax.f32 %v1114_v42, %v1419_v4  ;;  %v256_v4 = vmax.f32 %v248_v0, %v1464_v20  ;;  %v1855_v52 = vld [vmem:[#allocation48_spill] sm:$0xff]  ;;  %v1864_v60 = vld [vmem:[#allocation53_spill] sm:$0xff] }
 0x146   :  { %v312_v13 = vmax.f32 %v304_v26, %v1484_v1  ;;  %v1865_v0 = vld [vmem:[#allocation8_spill] sm:$0xff] }
 0x147   :  { %v856_v34 = vrot.slane %v574_v33, 7  ;;  %v850_v7 = vsel %vm578_vm0, %v849_v45, %v565_v25  ;;  %v223_v63 = vmax.f32 %v215_v15, %v1432_v32  ;;  %v264_v6 = vmax.f32 %v256_v4, %v1468_v23 }
 0x148   :  { %525 = vrot.lane.b32.xlu1 %v1073_v17, %s1002_s0  ;;  %697 = vrot.lane.b32.xlu0 %v696_v12, %s1018_s6  ;;  %v488_v48 = vpop.permute.xlu1 %487  ;;  %v478_v62 = vpop.permute.xlu0 %477 }
 0x149   :  { %v483_v44 = vmax.f32 %v1384_v16, %v478_v62  ;;  %v492_v30 = vmax.f32 %v484_v21, %v488_v48  ;;  %v320_v62 = vmax.f32 %v312_v13, %v1855_v52  ;;  %v1859_v21 = vld [vmem:[#allocation42_spill] sm:$0xff] }
 0x14b   :  { %v726_v53 = vrot.slane %v492_v30, 7  ;;  %v720_v61 = vsel %vm578_vm0, %v719_v51, %v483_v44 }
 0x14c   :  { %387 = vrot.lane.b32.xlu1 %v1515_v14, %s1004_s21  ;;  %704 = vrot.lane.b32.xlu0 %v1543_v47, %s1019_s7  ;;  %v486_v35 = vpop.permute.xlu1 %485  ;;  %v568_v11 = vpop.permute.xlu0 %567 }
 0x14d   :  { %v573_v49 = vmax.f32 %v565_v25, %v568_v11  ;;  %v491_v54 = vmax.f32 %v483_v44, %v486_v35  ;;  %v1858_v35 = vld [vmem:[#allocation50_spill] sm:$0xff]  ;;  %v1860_v44 = vld [vmem:[#allocation47_spill] sm:$0xff] }
 0x14e   :  { %v328_v1 = vmax.f32 %v320_v62, %v1858_v35 }
 0x14f   :  { %v1578_v16 = vsel %vm578_vm0, %v856_v34, %v573_v49  ;;  %v727_v22 = vsel %vm578_vm0, %v726_v53, %v491_v54  ;;  %v1861_v49 = vld [vmem:[#allocation52_spill] sm:$0xff] }
 0x150   :  { %707 = vrot.lane.b32.xlu1 %v1543_v47, %s1001_s17  ;;  %838 = vrot.lane.b32.xlu0 %v1551_v31, %s1009_s26  ;;  %v1566_v38 = vpop.permute.xlu1 %341  ;;  %v1573_v27 = vpop.permute.xlu0 %339  ;;  %v336_v50 = vmax.f32 %v328_v1, %v1861_v49  ;;  %v1867_v49 = vld [vmem:[#allocation10_spill] sm:$0xff] }
 0x152   :  { %v593_v15 = vrot.slane %v336_v50, 7 }
 0x154   :  { %841 = vrot.lane.b32.xlu1 %v1551_v31, %s1011_s28  ;;  %844 = vrot.lane.b32.xlu0 %v1560_v40, %s1013_s30  ;;  %v502_v55 = vpop.permute.xlu1 %501  ;;  %v1584_v58 = vpop.permute.xlu0 %347 }
 0x158   :  { %711 = vrot.lane.b32.xlu1 %v1543_v47, %s1002_s0  ;;  %851 = vrot.lane.b32.xlu0 %v850_v7, %s1020_s8  ;;  %v500_v2 = vpop.permute.xlu1 %499  ;;  %v350_v42 = vpop.permute.xlu0 %349 }
 0x159   :  { %v505_v25 = vmax.f32 %v1859_v21, %v500_v2 }
 0x15c   :  { %714 = vrot.lane.b32.xlu1 %v696_v12, %s1005_s22  ;;  %858 = vrot.lane.b32.xlu0 %v1578_v16, %s1001_s17  ;;  %v231_v12 = vmax.f32 %v223_v63, %v1441_v18  ;;  %v287_v18 = vmax.f32 %v1131_v56, %v1474_v5  ;;  %v358_v20 = vpop.permute.xlu1 %357  ;;  %v510_v48 = vpop.permute.xlu0 %509  ;;  %v1856_v56 = vld [vmem:[#allocation44_spill] sm:$0xff] }
 0x15e   :  { %v239_v3 = vmax.f32 %v231_v12, %v1452_v19  ;;  %v506_v19 = vmax.f32 %v1852_v43, %v502_v55  ;;  %v295_v9 = vmax.f32 %v287_v18, %v1854_v39  ;;  %v346_v12 = vmax.f32 %v1865_v0, %v1566_v38 }
 0x160   :  { %721 = vrot.lane.b32.xlu1 %v720_v61, %s1021_s9  ;;  %728 = vrot.lane.b32.xlu0 %v727_v22, %s1022_s10  ;;  %v247_v32 = vmax.f32 %v239_v3, %v1460_v24  ;;  %v583_v24 = vrot.slane %v264_v6, 7  ;;  %v303_v33 = vmax.f32 %v295_v9, %v1857_v46  ;;  %v760_v45 = vrot.slane %v506_v19, 7  ;;  %v508_v34 = vpop.permute.xlu1 %507  ;;  %v374_v2 = vpop.permute.xlu0 %373 }
 0x161   :  { %v514_v11 = vmax.f32 %v506_v19, %v510_v48  ;;  %v513_v55 = vmax.f32 %v505_v25, %v508_v34  ;;  %v354_v36 = vmax.f32 %v346_v12, %v350_v42  ;;  %v345_v3 = vmax.f32 %v1065_v10, %v1573_v27 }
 0x162   :  { %v255_v23 = vmax.f32 %v247_v32, %v1853_v41  ;;  %v311_v30 = vmax.f32 %v303_v33, %v1860_v44  ;;  %v761_v57 = vsel %vm578_vm0, %v760_v45, %v505_v25  ;;  %v378_v62 = vmax.f32 %v1448_v28, %v374_v2 }
 0x163   :  { %v767_v54 = vrot.slane %v514_v11, 7  ;;  %v362_v32 = vmax.f32 %v354_v36, %v358_v20  ;;  %v353_v18 = vmax.f32 %v345_v3, %v1584_v58  ;;  %v1874_v3 = vld [vmem:[#allocation19_spill] sm:$0xff] }
 0x164   :  { %862 = vrot.lane.b32.xlu1 %v1578_v16, %s1002_s0  ;;  %731 = vrot.lane.b32.xlu0 %v727_v22, %s1023_s11  ;;  %v263_v5 = vmax.f32 %v255_v23, %v1856_v56  ;;  %v520_v4 = vpop.permute.xlu0 %519 }
 0x165   :  { %v1634_v63 = vsel %vm578_vm0, %v767_v54, %v513_v55  ;;  %v603_v19 = vrot.slane %v362_v32, 7  ;;  %v524_v42 = vmax.f32 %v1106_v37, %v520_v4  ;;  %v1873_v4 = vld [vmem:[#allocation11_spill] sm:$0xff] }
 0x166   :  { %v584_v51 = vsel %vm578_vm0, %v583_v24, %v263_v5 }
 0x167   :  { %v784_v9 = vrot.slane %v524_v42, 7 }
 0x168   :  { %865 = vrot.lane.b32.xlu1 %v1578_v16, %s1005_s22  ;;  %734 = vrot.lane.b32.xlu0 %v727_v22, %s1024_s12 }
 0x16c   :  { %868 = vrot.lane.b32.xlu1 %v850_v7, %s1007_s24  ;;  %737 = vrot.lane.b32.xlu0 %v727_v22, %s1019_s7  ;;  %v1862_v7 = vld [vmem:[#allocation49_spill] sm:$0xff] }
 0x16d   :  { %v319_v53 = vmax.f32 %v311_v30, %v1862_v7  ;;  %v1866_v30 = vld [vmem:[#allocation14_spill] sm:$0xff] }
 0x16e   :  { %v94_v50 = vmax.f32 %v1867_v49, %v1866_v30  ;;  %v1885_v30 = vld [vmem:[#allocation26_spill] sm:$0xff] }
 0x16f   :  { %v327_v22 = vmax.f32 %v319_v53, %v1863_v59  ;;  %v1868_v53 = vld [vmem:[#allocation13_spill] sm:$0xff]  ;;  %v1869_v59 = vld [vmem:[#allocation12_spill] sm:$0xff] }
 0x170   :  { %585 = vrot.lane.b32.xlu1 %v584_v51, %s1017_s5  ;;  %755 = vrot.lane.b32.xlu0 %v720_v61, %s1015_s3  ;;  %v102_v54 = vmax.f32 %v94_v50, %v1868_v53 }
 0x171   :  { %v335_v29 = vmax.f32 %v327_v22, %v1864_v60  ;;  %v1870_v22 = vld [vmem:[#allocation9_spill] sm:$0xff]  ;;  %v1871_v60 = vld [vmem:[#allocation15_spill] sm:$0xff] }
 0x173   :  { %v594_v61 = vsel %vm578_vm0, %v593_v15, %v335_v29  ;;  %v93_v15 = vmax.f32 %v1870_v22, %v1869_v59  ;;  %v110_v29 = vmax.f32 %v102_v54, %v1871_v60 }
 0x174   :  { %762 = vrot.lane.b32.xlu1 %v761_v57, %s1017_s5  ;;  %588 = vrot.lane.b32.xlu0 %v584_v51, %s1007_s24 }
 0x175   :  { %v101_v36 = vmax.f32 %v93_v15, %v1873_v4 }
 0x178   :  { %595 = vrot.lane.b32.xlu1 %v594_v61, %s1020_s8  ;;  %770 = vrot.lane.b32.xlu0 %v1634_v63, %s1002_s0 }
 0x17c   :  { %598 = vrot.lane.b32.xlu1 %v594_v61, %s1005_s22  ;;  %773 = vrot.lane.b32.xlu0 %v1634_v63, %s1005_s22  ;;  %v1872_v61 = vld [vmem:[#allocation17_spill] sm:$0xff] }
 0x17d   :  { %v118_v2 = vmax.f32 %v110_v29, %v1872_v61  ;;  %v1889_v29 = vld [vmem:[#allocation30_spill] sm:$0xff] }
 0x17f   :  { %v126_v32 = vmax.f32 %v118_v2, %v1874_v3  ;;  %v1890_v2 = vld [vmem:[#allocation35_spill] sm:$0xff] }
 0x180   :  { %776 = vrot.lane.b32.xlu0 %v1634_v63, %s1007_s24 }
 0x184   :  { %779 = vrot.lane.b32.xlu0 %v761_v57, %s1009_s26 }
 0x1a2   :  { %v1650_v6 = vpop.permute.xlu1 %674  ;;  %v1652_v26 = vpop.permute.xlu0 %681 }
 0x1a6   :  { %v356_v13 = vpop.permute.xlu1 %355  ;;  %v372_v43 = vpop.permute.xlu0 %371 }
 0x1a7   :  { %v361_v41 = vmax.f32 %v353_v18, %v356_v13  ;;  %v1875_v18 = vld [vmem:[#allocation16_spill] sm:$0xff] }
 0x1a8   :  { %v109_v13 = vmax.f32 %v101_v36, %v1875_v18 }
 0x1a9   :  { %v604_v23 = vsel %vm578_vm0, %v603_v19, %v361_v41  ;;  %v1876_v19 = vld [vmem:[#allocation21_spill] sm:$0xff] }
 0x1aa   :  { %v382_v39 = vpop.permute.xlu1 %381  ;;  %605 = vrot.lane.b32.xlu1 %v604_v23, %s1018_s6  ;;  %v685_v38 = vpop.permute.xlu0 %684  ;;  %v134_v41 = vmax.f32 %v126_v32, %v1876_v19  ;;  %v1891_v32 = vld [vmem:[#allocation32_spill] sm:$0xff] }
 0x1ab   :  { %v386_v5 = vmax.f32 %v378_v62, %v382_v39 }
 0x1ae   :  { %v518_v10 = vpop.permute.xlu1 %517  ;;  %608 = vrot.lane.b32.xlu1 %v604_v23, %s1001_s17  ;;  %v528_v27 = vpop.permute.xlu0 %527 }
 0x1af   :  { %v523_v20 = vmax.f32 %v1073_v17, %v518_v10  ;;  %v532_v56 = vmax.f32 %v524_v42, %v528_v27  ;;  %v377_v17 = vmax.f32 %v1515_v14, %v372_v43  ;;  %v740_v43 = vsel %vm644_vm1, %v1650_v6, %v1652_v26  ;;  %v1877_v10 = vld [vmem:[#allocation18_spill] sm:$0xff] }
 0x1b0   :  { %v117_v27 = vmax.f32 %v109_v13, %v1877_v10  ;;  %v1892_v13 = vld [vmem:[#allocation37_spill] sm:$0xff] }
 0x1b1   :  { %v785_v58 = vsel %vm578_vm0, %v784_v9, %v523_v20  ;;  %v791_v35 = vrot.slane %v532_v56, 7 }
 0x1b2   :  { %v688_v48 = vpop.permute.xlu1 %687  ;;  %611 = vrot.lane.b32.xlu1 %v604_v23, %s1003_s20  ;;  %786 = vrot.lane.b32.xlu0 %v785_v58, %s1025_s13  ;;  %v380_v24 = vpop.permute.xlu0 %379 }
 0x1b3   :  { %v385_v21 = vmax.f32 %v377_v17, %v380_v24  ;;  %v1882_v17 = vld [vmem:[#allocation27_spill] sm:$0xff] }
 0x1b6   :  { %v390_v52 = vpop.permute.xlu1 %389  ;;  %614 = vrot.lane.b32.xlu1 %v604_v23, %s1005_s22  ;;  %v691_v37 = vpop.permute.xlu0 %690  ;;  %v741_v23 = vsel %vm646_vm2, %v740_v43, %v685_v38 }
 0x1b7   :  { %v394_v1 = vmax.f32 %v386_v5, %v390_v52  ;;  %v742_v9 = vsel %vm648_vm3, %v741_v23, %v688_v48  ;;  %v1880_v52 = vld [vmem:[#allocation25_spill] sm:$0xff]  ;;  %v1881_v5 = vld [vmem:[#allocation22_spill] sm:$0xff] }
 0x1b8   :  { %v743_v26 = vsel %vm650_vm4, %v742_v9, %v691_v37  ;;  %v1894_v9 = vld [vmem:[#allocation39_spill] sm:$0xff] }
 0x1b9   :  { %v619_v44 = vrot.slane %v394_v1, 7  ;;  %v1883_v1 = vld [vmem:[#allocation24_spill] sm:$0xff] }
 0x1ba   :  { %v526_v46 = vpop.permute.xlu1 %525  ;;  %v698_v33 = vpop.permute.xlu0 %697 }
 0x1bb   :  { %v531_v45 = vmax.f32 %v523_v20, %v526_v46  ;;  %v1878_v20 = vld [vmem:[#allocation23_spill] sm:$0xff]  ;;  %v744_v24 = vsel %vm652_vm5, %v743_v26, %v698_v33  ;;  %v1895_v26 = vld [vmem:[#allocation36_spill] sm:$0xff] }
 0x1bc   :  { %v142_v6 = vmax.f32 %v134_v41, %v1878_v20 }
 0x1bd   :  { %v1667_v25 = vsel %vm578_vm0, %v791_v35, %v531_v45 }
 0x1be   :  { %v388_v11 = vpop.permute.xlu1 %387  ;;  %793 = vrot.lane.b32.xlu0 %v1667_v25, %s1024_s12  ;;  %v705_v34 = vpop.permute.xlu0 %704  ;;  %v150_v62 = vmax.f32 %v142_v6, %v1880_v52  ;;  %v1896_v52 = vld [vmem:[#allocation38_spill] sm:$0xff] }
 0x1bf   :  { %v393_v28 = vmax.f32 %v385_v21, %v388_v11  ;;  %v1884_v21 = vld [vmem:[#allocation29_spill] sm:$0xff] }
 0x1c0   :  { %v158_v35 = vmax.f32 %v150_v62, %v1882_v17 }
 0x1c1   :  { %v1674_v51 = vsel %vm578_vm0, %v619_v44, %v393_v28 }
 0x1c2   :  { %v708_v14 = vpop.permute.xlu1 %707  ;;  %796 = vrot.lane.b32.xlu0 %v1667_v25, %s1019_s7  ;;  %621 = vrot.lane.b32.xlu1 %v1674_v51, %s1026_s14  ;;  %v839_v7 = vpop.permute.xlu0 %838  ;;  %v166_v11 = vmax.f32 %v158_v35, %v1884_v21 }
 0x1c6   :  { %v842_v55 = vpop.permute.xlu1 %841  ;;  %799 = vrot.lane.b32.xlu0 %v1667_v25, %s1001_s17  ;;  %624 = vrot.lane.b32.xlu1 %v1674_v51, %s1024_s12  ;;  %v845_v57 = vpop.permute.xlu0 %844  ;;  %s1029_s17 = smov 64  }
 0x1c7   :  { %v871_v33 = vsel %vm644_vm1, %v839_v7, %v842_v55  ;;  %v1886_v7 = vld [vmem:[#allocation31_spill] sm:$0xff]  ;;  %v1887_v55 = vld [vmem:[#allocation28_spill] sm:$0xff] }
 0x1c8   :  { %v872_v50 = vsel %vm646_vm2, %v871_v33, %v845_v57  ;;  %v174_v53 = vmax.f32 %v166_v11, %v1886_v7 }
 0x1ca   :  { %v712_v0 = vpop.permute.xlu1 %711  ;;  %803 = vrot.lane.b32.xlu0 %v785_v58, %s1002_s0  ;;  %627 = vrot.lane.b32.xlu1 %v1674_v51, %s1020_s8  ;;  %v852_v12 = vpop.permute.xlu0 %851  ;;  %v1879_v58 = vld [vmem:[#allocation20_spill] sm:$0xff]  ;;  %s973_s0 = scalar_lea.vmem %s910_s19, 64 }
 0x1cb   :  { %v125_v38 = vmax.f32 %v117_v27, %v1879_v58  ;;  %v873_v54 = vsel %vm648_vm3, %v872_v50, %v852_v12  ;;  %p974_p8 = scmp.ne.s32.totalorder %s910_s19, %s973_s0  ;;  %p979_p10 = scmp.lt.s32.totalorder %s973_s0, %s973_s0 }
 0x1cd   :  { %v133_v46 = vmax.f32 %v125_v38, %v1881_v5  ;;  %p980_p11 = por %p979_p10, %p978_p9 }
 0x1ce   :  { %v715_v39 = vpop.permute.xlu1 %714  ;;  %810 = vrot.lane.b32.xlu0 %v1560_v40, %s1027_s15  ;;  %635 = vrot.lane.b32.xlu1 %v1509_v8, %s1027_s15  ;;  %v859_v42 = vpop.permute.xlu0 %858  ;;  %v745_v40 = vsel %vm654_vm6, %v744_v24, %v705_v34 }
 0x1cf   :  { %v746_v37 = vsel %vm656_vm7, %v745_v40, %v708_v14  ;;  %v141_v45 = vmax.f32 %v133_v46, %v1883_v1  ;;  %p981_p12 = pnand %p980_p11, %p974_p8 }
 0x1d0   :  { %v747_v34 = vsel %vm658_vm8, %v746_v37, %v1543_v47 }
 0x1d1   :  { %v149_v49 = vmax.f32 %v141_v45, %v1885_v30  ;;  %v748_v14 = vsel %vm660_vm9, %v747_v34, %v712_v0 }
 0x1d2   :  { %v722_v56 = vpop.permute.xlu1 %721  ;;  %817 = vrot.lane.b32.xlu0 %v1551_v31, %s1028_s16  ;;  %638 = vrot.lane.b32.xlu1 %v1509_v8, %s1022_s10  ;;  %v729_v48 = vpop.permute.xlu0 %728  ;;  %v749_v47 = vsel %vm662_vm10, %v748_v14, %v715_v39 }
 0x1d3   :  { %v157_v59 = vmax.f32 %v149_v49, %v1887_v55  ;;  %v750_v22 = vsel %vm664_vm11, %v749_v47, %v722_v56  ;;  %v1897_v56 = vld [vmem:[#allocation40_spill] sm:$0xff] }
 0x1d4   :  { %v751_v12 = vsel %vm666_vm12, %v750_v22, %v729_v48 }
 0x1d5   :  { %v165_v61 = vmax.f32 %v157_v59, %v1889_v29 }
 0x1d6   :  { %v863_v44 = vpop.permute.xlu1 %862  ;;  %820 = vrot.lane.b32.xlu0 %v1551_v31, %s1022_s10  ;;  %641 = vrot.lane.b32.xlu1 %v1509_v8, %s1025_s13  ;;  %v732_v28 = vpop.permute.xlu0 %731  ;;  %v874_v31 = vsel %vm650_vm4, %v873_v54, %v859_v42  ;;  %v1888_v8 = vld [vmem:[#allocation33_spill] sm:$0xff] }
 0x1d7   :  { %v182_v15 = vmax.f32 %v174_v53, %v1888_v8  ;;  %v875_v4 = vsel %vm652_vm5, %v874_v31, %v1578_v16  ;;  %v752_v3 = vsel %vm668_vm13, %v751_v12, %v732_v28  ;;  %v173_v18 = vmax.f32 %v165_v61, %v1891_v32  ;;  %v1893_v16 = vld [vmem:[#allocation34_spill] sm:$0xff] }
 0x1d8   :  { %v876_v36 = vsel %vm654_vm6, %v875_v4, %v863_v44 }
 0x1d9   :  { %v190_v0 = vmax.f32 %v182_v15, %v1890_v2  ;;  %v181_v27 = vmax.f32 %v173_v18, %v1893_v16 }
 0x1da   :  { %v866_v60 = vpop.permute.xlu1 %865  ;;  %v735_v57 = vpop.permute.xlu0 %734 }
 0x1db   :  { %v198_v43 = vmax.f32 %v190_v0, %v1892_v13  ;;  %v877_v19 = vsel %vm656_vm7, %v876_v36, %v866_v60  ;;  %v753_v41 = vsel %vm670_vm14, %v752_v3, %v735_v57  ;;  %v189_v58 = vmax.f32 %v181_v27, %v1895_v26 }
 0x1dd   :  { %v206_v20 = vmax.f32 %v198_v43, %v1894_v9  ;;  %v197_v62 = vmax.f32 %v189_v58, %v1896_v52 }
 0x1de   :  { %v869_v23 = vpop.permute.xlu1 %868  ;;  %v738_v39 = vpop.permute.xlu0 %737 }
 0x1df   :  { %v878_v42 = vsel %vm658_vm8, %v877_v19, %v869_v23  ;;  %v754_v10 = vsel %vm672_vm15, %v753_v41, %v738_v39  ;;  %v577_v40 = vrot.slane %v206_v20, 7  ;;  %v205_v48 = vmax.f32 %v197_v62, %v1897_v56 }
 0x1e0   :  { %v879_v6 = vsel %vm660_vm9, %v878_v42, 0.0  ;;  %881 = vrot.lane.b32.xlu1 %v754_v10, %s1029_s17 }
 0x1e1   :  { %885 = vrot.lane.b32.xlu0 %v879_v6, %s1029_s17  ;;  %v579_v17 = vsel %vm578_vm0, %v577_v40, %v205_v48  ;;  %vm888_vm0 = vcmask 523264  }
 0x1e2   :  { %v586_v38 = vpop.permute.xlu1 %585  ;;  %v756_v24 = vpop.permute.xlu0 %755 }
 0x1e3   :  { %v645_v35 = vsel %vm644_vm1, %v579_v17, %v586_v38 }
 0x1e6   :  { %v763_v5 = vpop.permute.xlu1 %762  ;;  %v589_v46 = vpop.permute.xlu0 %588 }
 0x1e7   :  { %v823_v37 = vsel %vm644_vm1, %v756_v24, %v763_v5  ;;  %v647_v33 = vsel %vm646_vm2, %v645_v35, %v589_v46 }
 0x1e8   :  { %v824_v45 = vsel %vm646_vm2, %v823_v37, %v1634_v63 }
 0x1ea   :  { %v596_v1 = vpop.permute.xlu1 %595  ;;  %v771_v21 = vpop.permute.xlu0 %770 }
 0x1eb   :  { %v649_v11 = vsel %vm648_vm3, %v647_v33, %v596_v1  ;;  %v825_v34 = vsel %vm648_vm3, %v824_v45, %v771_v21 }
 0x1ee   :  { %v599_v44 = vpop.permute.xlu1 %598  ;;  %v774_v28 = vpop.permute.xlu0 %773 }
 0x1ef   :  { %v651_v30 = vsel %vm650_vm4, %v649_v11, %v599_v44  ;;  %v826_v49 = vsel %vm650_vm4, %v825_v34, %v774_v28 }
 0x1f2   :  { %v777_v14 = vpop.permute.xlu0 %776 }
 0x1f3   :  { %v827_v2 = vsel %vm652_vm5, %v826_v49, %v777_v14 }
 0x1f6   :  { %v780_v53 = vpop.permute.xlu0 %779 }
 0x1f7   :  { %v828_v12 = vsel %vm654_vm6, %v827_v2, %v780_v53 }
 0x21c   :  { %v606_v50 = vpop.permute.xlu1 %605 }
 0x21d   :  { %v653_v61 = vsel %vm652_vm5, %v651_v30, %v606_v50 }
 0x220   :  { %v609_v7 = vpop.permute.xlu1 %608 }
 0x221   :  { %v655_v0 = vsel %vm654_vm6, %v653_v61, %v609_v7 }
 0x224   :  { %v612_v54 = vpop.permute.xlu1 %611  ;;  %v787_v47 = vpop.permute.xlu0 %786 }
 0x225   :  { %v657_v4 = vsel %vm656_vm7, %v655_v0, %v612_v54  ;;  %v829_v3 = vsel %vm656_vm7, %v828_v12, %v787_v47 }
 0x228   :  { %v615_v55 = vpop.permute.xlu1 %614 }
 0x229   :  { %v659_v32 = vsel %vm658_vm8, %v657_v4, %v615_v55 }
 0x230   :  { %v794_v59 = vpop.permute.xlu0 %793 }
 0x231   :  { %v830_v13 = vsel %vm658_vm8, %v829_v3, %v794_v59 }
 0x234   :  { %v622_v63 = vpop.permute.xlu1 %621  ;;  %v797_v31 = vpop.permute.xlu0 %796 }
 0x235   :  { %v661_v43 = vsel %vm660_vm9, %v659_v32, %v622_v63  ;;  %v831_v19 = vsel %vm660_vm9, %v830_v13, %v797_v31 }
 0x238   :  { %v625_v22 = vpop.permute.xlu1 %624  ;;  %v800_v8 = vpop.permute.xlu0 %799 }
 0x239   :  { %v663_v41 = vsel %vm662_vm10, %v661_v43, %v625_v22  ;;  %v832_v23 = vsel %vm662_vm10, %v831_v19, %v800_v8 }
 0x23a   :  { %v833_v10 = vsel %vm664_vm11, %v832_v23, %v1667_v25 }
 0x23c   :  { %v628_v15 = vpop.permute.xlu1 %627  ;;  %v804_v60 = vpop.permute.xlu0 %803 }
 0x23d   :  { %v665_v39 = vsel %vm664_vm11, %v663_v41, %v628_v15  ;;  %v834_v9 = vsel %vm666_vm12, %v833_v10, %v804_v60 }
 0x23e   :  { %v667_v16 = vsel %vm666_vm12, %v665_v39, %v1674_v51 }
 0x240   :  { %v636_v57 = vpop.permute.xlu1 %635  ;;  %v811_v29 = vpop.permute.xlu0 %810 }
 0x241   :  { %v669_v20 = vsel %vm668_vm13, %v667_v16, %v636_v57  ;;  %v835_v6 = vsel %vm668_vm13, %v834_v9, %v811_v29 }
 0x244   :  { %v639_v36 = vpop.permute.xlu1 %638  ;;  %v818_v18 = vpop.permute.xlu0 %817 }
 0x245   :  { %v671_v26 = vsel %vm670_vm14, %v669_v20, %v639_v36  ;;  %v836_v58 = vsel %vm670_vm14, %v835_v6, %v818_v18 }
 0x248   :  { %v642_v42 = vpop.permute.xlu1 %641  ;;  %v821_v27 = vpop.permute.xlu0 %820 }
 0x249   :  { %v673_v38 = vsel %vm672_vm15, %v671_v26, %v642_v42  ;;  %v837_v25 = vsel %vm672_vm15, %v836_v58, %v821_v27 }
 0x252   :  { %v882_v24 = vpop.permute.xlu1 %881 }
 0x253   :  { %v889_v51 = vsel %vm888_vm0, %v673_v38, %v882_v24  ;;  %v886_v52 = vpop.permute.xlu0 %885 }
 0x254   :  { %v890_v62 = vsel %vm888_vm0, %v837_v25, %v886_v52 }
 0x255   :  { %v893_v40 = vcombine.low %v889_v51, %v890_v62 }
 0x257   :  { %918 = vst.sshfl [vmem:[#allocation5] sm:$0x33 pattern:$0x76325410] %v893_v40 }
 0x258   :  { %984 = shalt.err (!%p981_p12)
}
 0x259   :  { %s985_s22 = scalar_lea.hbm %s1800_s1, 64 }
 0x25a   :  { %p986_p13 = scmp.ne.s32.totalorder %s1800_s1, %s985_s22  ;;  %p989_p0 = scmp.lt.u32.totalorder %s985_s22, %s1800_s1 }
 0x25c   :  { %p991_p1 = pnand %p989_p0, %p986_p13 }
 0x25e   :  { %994 = shalt.err (!%p991_p1)
}
 0x25f   :  { %912 = dma.vmem_to_hbm [thread:$0]  %s910_s19, 64, %s1800_s1, [#allocation4]  }
 0x260   :  { %997 = dma.done.wait [#allocation4], 64  }
 0x261   :  { %998 = vsyncadd [#allocation4], 4294967232 }
 0x262   :  { %916 = vsyncpa [#allocation3], 1 }
 0x263   :  { %917 = vsyncpa [#allocation4], 1 }

</bundles_post_ra>
